<compile_context>
chip_gen: v7x
topology: tpu7x:2x2x1
jax: 0.10.0
libtpu: 0.0.40
codegen_flags: <defaults>
</compile_context>

<pallas_src>
import math
from functools import partial

import jax
import jax.numpy as jnp
import numpy as np
from jax import lax
from jax.experimental import pallas as pl
from jax.experimental.pallas import tpu as pltpu

BASE_CH = 4        # G  (number of correlation groups = args['base_ch'])
ATTN_TEMP = 2.0    # args.get('attn_temp', 2.0) for 'epipole' fusion
DEPTH_TMP = 2.0    # `tmp` argument of forward (depth_type == 'ce', eval path)


# ---------------------------------------------------------------------------
# homo_warping_3D_with_mask — plain-JAX glue (projection matmuls + bilinear
# grid-sample with zeros padding / align_corners=True).  Blend accumulated in
# f32, result emitted directly as bf16 (no separate f32 materialize + cast).
# ---------------------------------------------------------------------------
def homo_warping_3d_with_mask(src_fea, src_proj, ref_proj, depth_values):
    # TODO(synk): the bilinear grid-sample gather has no clean Pallas/TPU
    # equivalent; the warping stays in plain JAX glue.
    B, C, H, W = src_fea.shape
    D = depth_values.shape[1]
    proj = src_proj @ jnp.linalg.inv(ref_proj)                 # (B,4,4)
    rot = proj[:, :3, :3]
    trans = proj[:, :3, 3:4]                                   # (B,3,1)

    y, x = jnp.meshgrid(jnp.arange(H, dtype=jnp.float32),
                        jnp.arange(W, dtype=jnp.float32), indexing='ij')
    xyz = jnp.stack([x.ravel(), y.ravel(),
                     jnp.ones(H * W, jnp.float32)], axis=0)    # (3, HW)
    rot_xyz = jnp.einsum('bij,jn->bin', rot, xyz)              # (B,3,HW)
    rot_depth_xyz = rot_xyz[:, :, None, :] * depth_values[:, None, :, None]
    proj_xyz = rot_depth_xyz + trans[:, :, None, :]            # (B,3,D,HW)
    z = proj_xyz[:, 2]                                         # (B,D,HW)
    zs = jnp.where(jnp.abs(z) < 1e-6, 1e-6, z)
    px = proj_xyz[:, 0] / zs
    py = proj_xyz[:, 1] / zs
    x_n = px / ((W - 1) / 2.0) - 1.0
    y_n = py / ((H - 1) / 2.0) - 1.0
    invalid = (x_n < -1.0) | (x_n > 1.0) | (y_n < -1.0) | (y_n > 1.0) | (z <= 0)
    proj_mask = invalid.astype(jnp.float32).reshape(B, D, H, W)

    # bilinear sampling, zeros padding, align_corners=True
    x0 = jnp.floor(px); y0 = jnp.floor(py)
    x1 = x0 + 1.0;      y1 = y0 + 1.0
    wx1 = px - x0; wx0 = 1.0 - wx1
    wy1 = py - y0; wy0 = 1.0 - wy1
    img = src_fea.reshape(B, C, H * W)

    def gather(ix, iy):
        inb = ((ix >= 0) & (ix <= W - 1) & (iy >= 0) & (iy <= H - 1))
        ixc = jnp.clip(ix, 0, W - 1).astype(jnp.int32)
        iyc = jnp.clip(iy, 0, H - 1).astype(jnp.int32)
        flat = (iyc * W + ixc).reshape(B, -1)                  # (B, D*HW)
        g = jax.vmap(lambda im, idx: im[:, idx])(img, flat)    # (B, C, D*HW)
        g = g.reshape(B, C, D, H * W)
        return g * inb.reshape(B, 1, D, H * W).astype(src_fea.dtype)

    out = (gather(x0, y0) * (wx0 * wy0)[:, None] +
           gather(x1, y0) * (wx1 * wy0)[:, None] +
           gather(x0, y1) * (wx0 * wy1)[:, None] +
           gather(x1, y1) * (wx1 * wy1)[:, None])
    return out.astype(jnp.bfloat16).reshape(B, C, D, H, W), proj_mask


# ---------------------------------------------------------------------------
# Fused StageNet Pallas kernel: group correlation, 'epipole' visibility
# softmax fusion, cosine-similarity accumulation, cost projection, depth
# softmax / regression / confidence / sim_depth.
# Grid: (batch, pixel-tile); everything inside works on a (*, TN) slab.
# ---------------------------------------------------------------------------
def _stagenet_kernel(ref_ref, warped_ref, dv_ref, w_ref,
                     ppre_ref, pvol_ref, depth_ref, conf_ref, simdepth_ref,
                     *, V, G, Cg, D, TN, tmp):
    b = pl.program_id(0)

    C = G * Cg
    inv_sqrt_c = 1.0 / math.sqrt(C)
    vis_scale = 1.0 / (Cg * ATTN_TEMP)   # folds the mean over Cg + attn temp
    inv_cg = 1.0 / Cg

    # F.normalize(ref_volume, dim=G): reciprocal of the group-axis L2 norm.
    # Reference groups are re-read from VMEM per use (loads are cheap; keeps
    # the vreg working set small).
    ref_sq = None
    for g in range(G):
        r = ref_ref[0, g].astype(jnp.float32)                   # (Cg, TN)
        ref_sq = r * r if ref_sq is None else ref_sq + r * r
    inv_ref_nrm = lax.rsqrt(jnp.maximum(ref_sq, 1e-24))          # (Cg, TN)

    vol_acc = jnp.zeros((D, TN), jnp.float32)   # sum_v (sum_g w'[g]*in_prod)*vis
    vis_sum = jnp.zeros((D, TN), jnp.float32)
    sims = jnp.zeros((D, TN), jnp.float32)

    for v in range(V):
        psum = None     # sum_g ref[g]*warp[g]                   (Cg, D, TN)
        wv_sq = None    # sum_g warp[g]^2                        (Cg, D, TN)
        sim_sum = None  # sum_g sum_Cg ref*warp      (no 1/Cg)   (D, TN)
        wsum = None     # sum_g (w[g]/Cg) sum_Cg ref*warp        (D, TN)
        for g in range(G):
            # (Cg*D, TN) fully-packed bf16 tiles -> f32 -> split back to (Cg,D)
            wvg = warped_ref[0, v * G + g].astype(jnp.float32).reshape(Cg, D, TN)
            r = ref_ref[0, g].astype(jnp.float32)                # (Cg, TN)
            pg = r[:, None, :] * wvg                             # (Cg, D, TN)
            psum = pg if psum is None else psum + pg
            sq = wvg * wvg
            wv_sq = sq if wv_sq is None else wv_sq + sq
            pgs = pg.sum(axis=0)                                 # (D, TN)
            sim_sum = pgs if sim_sum is None else sim_sum + pgs
            wpgs = pgs * (w_ref[g] * inv_cg)
            wsum = wpgs if wsum is None else wsum + wpgs

        # 'epipole' fusion: softmax_D(mean_Cg(sum_G)/attn_temp) / sqrt(C)
        # (1/sqrt(C) folded into vis, matching the reference — vis_sum carries
        #  the same scaling, so the +1e-6 epsilon placement is identical).
        logits = sim_sum * vis_scale
        m = jnp.max(logits, axis=0, keepdims=True)
        e = jnp.exp(logits - m)
        inv_den = pl.reciprocal(jnp.sum(e, axis=0, keepdims=True), approx=True)
        vis = e * (inv_den * inv_sqrt_c)                         # (D, TN)

        vol_acc = vol_acc + wsum * vis
        vis_sum = vis_sum + vis

        # Eval-mode cosine similarity (normalize over the group axis).  Only
        # the argmax over D is consumed downstream, so the constant 1/Cg mean
        # factor is dropped (argmax-invariant).
        inv_wv_nrm = lax.rsqrt(jnp.maximum(wv_sq, 1e-24))        # (Cg, D, TN)
        sims = sims + (psum * (inv_wv_nrm * inv_ref_nrm[:, None, :])).sum(axis=0)

    # volume_mean = volume_sum / (vis_sum + 1e-6), then cost regularization.
    # TODO(synk): CostRegNet2D (2D U-Net) weights are not part of the provided
    # reference; substituted with a deterministic 1x1 conv (G -> 1) + bias,
    # folded linearly into the per-group weights above.
    cost = vol_acc / (vis_sum + 1e-6) + w_ref[G]                 # exact divide
    ppre_ref[0] = cost                                           # prob_volume_pre

    # prob_volume = softmax_D(cost).  photometric_confidence = max_D(prob) ==
    # 1/sum(exp(cost-m)) since max(exp(cost-m)) == 1 exactly.  Exact divides:
    # these feed returned tensors and run once per tile (off the hot loop).
    m = jnp.max(cost, axis=0, keepdims=True)
    e = jnp.exp(cost - m)
    inv_den = 1.0 / jnp.sum(e, axis=0, keepdims=True)
    pvol_ref[0] = e * inv_den
    conf_ref[0] = inv_den

    # depth_type == 'ce', eval: depth_regression(softmax(pre * tmp), dv).
    # Reuse m (constant shifts are softmax-invariant); for tmp == 2 reuse e
    # as exp((cost-m)*2) == e*e — no second exp / max pass.
    if tmp == 2.0:
        et = e * e
    else:
        et = jnp.exp((cost - m) * tmp)
    inv_den_t = 1.0 / jnp.sum(et, axis=0, keepdims=True)

    # Weighted-depth accumulation via scalar SMEM broadcasts — no (D, TN)
    # depth-value broadcast table.
    depth_num = jnp.zeros((1, TN), jnp.float32)
    for d in range(D):
        depth_num = depth_num + et[d:d + 1, :] * dv_ref[b, d]
    depth_ref[0] = depth_num * inv_den_t

    # sim_depth = depth_values[argmax_D(similarities)]  (first-max tie break;
    # implements the intended gather for per-batch depth hypotheses).
    smax = jnp.max(sims, axis=0, keepdims=True)
    iota_d = lax.broadcasted_iota(jnp.int32, (D, TN), 0)
    idx = jnp.min(jnp.where(sims == smax, iota_d, D), axis=0, keepdims=True)
    sd = jnp.zeros((1, TN), jnp.float32)
    for d in range(D):
        sd = jnp.where(idx == d, dv_ref[b, d], sd)
    simdepth_ref[0] = sd


def _choose_tile_n(n, cap=512):
    """Lane-dense pixel tile: multiple of 128, capped so the f32 working set
    (two (Cg,D,TN) view accumulators + five (D,TN) accumulators) stays inside
    the 64-vreg file.  The pixel axis is padded to a multiple of the tile in
    the wrapper, so no un-tiled fallback can ever occur (v7x 64 MiB VMEM /
    masked-store hazard)."""
    n128 = ((n + 127) // 128) * 128
    return min(cap, n128)


# ---------------------------------------------------------------------------
# Wrapper: projection fusion + warping (JAX glue), then fused Pallas kernel.
# ---------------------------------------------------------------------------
def stagenet_forward(features, proj_matrices, depth_values, tmp=DEPTH_TMP):
    B, NV, C, H, W = features.shape
    V = NV - 1
    G = BASE_CH
    assert C % G == 0
    Cg = C // G
    D = depth_values.shape[1]
    N = H * W

    features = features.astype(jnp.float32)
    depth_values = depth_values.astype(jnp.float32)

    # projection-matrix fusion (same as the autocast(False) block of forward)
    ref_proj = proj_matrices[:, 0]
    ref_proj_new = ref_proj[:, 0].at[:, :3, :4].set(
        jnp.matmul(ref_proj[:, 1, :3, :3], ref_proj[:, 0, :3, :4]))
    warped_views = []
    for v in range(V):
        src_proj = proj_matrices[:, v + 1]
        src_proj_new = src_proj[:, 0].at[:, :3, :4].set(
            jnp.matmul(src_proj[:, 1, :3, :3], src_proj[:, 0, :3, :4]))
        warped, _mask = homo_warping_3d_with_mask(
            features[:, v + 1], src_proj_new, ref_proj_new, depth_values)
        warped_views.append(warped)
    warped = jnp.stack(warped_views, axis=1)          # (B, V, C, D, H, W) bf16

    # bf16 inputs (kernel is HBM-bandwidth bound), f32 accumulation in-kernel.
    # (Cg, D) merged into one 16-row axis -> fully packed bf16 (16,128) tiles.
    ref_k = features[:, 0].reshape(B, G, Cg, N).astype(jnp.bfloat16)
    warped_k = warped.reshape(B, V * G, Cg * D, N)     # already bf16
    dv_k = depth_values                                # (B, D) -> SMEM

    # deterministic synthetic "cost regularization" parameters (G weights + bias)
    w = (jnp.arange(G + 1, dtype=jnp.float32) - G / 2.0) * 0.25

    TN = _choose_tile_n(N)
    n_tiles = -(-N // TN)
    N_pad = n_tiles * TN
    if N_pad != N:
        pad = ((0, 0), (0, 0), (0, 0), (0, N_pad - N))
        ref_k = jnp.pad(ref_k, pad)
        warped_k = jnp.pad(warped_k, pad)

    kernel = partial(_stagenet_kernel, V=V, G=G, Cg=Cg, D=D, TN=TN,
                     tmp=float(tmp))
    out_shapes = (
        jax.ShapeDtypeStruct((B, D, N_pad), jnp.float32),   # prob_volume_pre
        jax.ShapeDtypeStruct((B, D, N_pad), jnp.float32),   # prob_volume
        jax.ShapeDtypeStruct((B, 1, N_pad), jnp.float32),   # depth
        jax.ShapeDtypeStruct((B, 1, N_pad), jnp.float32),   # photometric_confidence
        jax.ShapeDtypeStruct((B, 1, N_pad), jnp.float32),   # sim_depth
    )

    # advisory cost estimate so XLA schedules the call against the warp glue
    flops = int(B * N_pad * (V * (C * D * 8 + D * 8) + D * 40))
    transcendentals = int(B * N_pad * (V * (D + 2 * C * D) + 2 * D))
    bytes_accessed = int(ref_k.size * 2 + warped_k.size * 2
                         + B * N_pad * (2 * D + 3) * 4)

    ppre, pvol, depth, conf, sim_depth = pl.pallas_call(
        kernel,
        out_shape=out_shapes,
        grid=(B, n_tiles),
        in_specs=[
            pl.BlockSpec((1, G, Cg, TN), lambda b, t: (b, 0, 0, t)),
            pl.BlockSpec((1, V * G, Cg * D, TN), lambda b, t: (b, 0, 0, t)),
            pl.BlockSpec(memory_space=pltpu.MemorySpace.SMEM),
            pl.BlockSpec(memory_space=pltpu.MemorySpace.SMEM),
        ],
        out_specs=[
            pl.BlockSpec((1, D, TN), lambda b, t: (b, 0, t)),
            pl.BlockSpec((1, D, TN), lambda b, t: (b, 0, t)),
            pl.BlockSpec((1, 1, TN), lambda b, t: (b, 0, t)),
            pl.BlockSpec((1, 1, TN), lambda b, t: (b, 0, t)),
            pl.BlockSpec((1, 1, TN), lambda b, t: (b, 0, t)),
        ],
        compiler_params=pltpu.CompilerParams(
            dimension_semantics=("parallel", "parallel"),
            vmem_limit_bytes=8 * 1024 * 1024),
        cost_estimate=pl.CostEstimate(flops=flops,
                                      transcendentals=transcendentals,
                                      bytes_accessed=bytes_accessed),
    )(ref_k, warped_k, dv_k, w)

    return {
        'depth': depth[:, 0, :N].reshape(B, H, W),
        'prob_volume': pvol[:, :, :N].reshape(B, D, H, W),
        'photometric_confidence': conf[:, 0, :N].reshape(B, H, W),
        'depth_values': depth_values,
        'prob_volume_pre': ppre[:, :, :N].reshape(B, D, H, W),
        'sim_depth': sim_depth[:, 0, :N].reshape(B, H, W),
    }


if __name__ == "__main__":
    key = jax.random.PRNGKey(0)
    B, NVIEWS, C, H, W = 2, 3, 8, 16, 16
    D = 8

    features = jax.random.normal(key, (B, NVIEWS, C, H, W), dtype=jnp.float32)

    # projection matrices: (B, nviews, 2, 4, 4); [., ., 0] extrinsic,
    # [., ., 1, :3, :3] intrinsic (MVSFormer convention).
    K = np.eye(4, dtype=np.float32)
    K[0, 0] = K[1, 1] = 8.0
    K[0, 2] = (W - 1) / 2.0
    K[1, 2] = (H - 1) / 2.0
    projs = np.zeros((B, NVIEWS, 2, 4, 4), dtype=np.float32)
    for b in range(B):
        for v in range(NVIEWS):
            E = np.eye(4, dtype=np.float32)
            E[0, 3] = 0.05 * v                # small baseline along x
            E[1, 3] = 0.02 * v * (b + 1)
            projs[b, v, 0] = E
            projs[b, v, 1] = K
    proj_matrices = jnp.asarray(projs)

    depth_values = jnp.broadcast_to(
        jnp.linspace(1.0, 2.0, D, dtype=jnp.float32)[None], (B, D))

    outputs = jax.jit(stagenet_forward)(features, proj_matrices, depth_values)
    jax.block_until_ready(outputs)

    assert outputs['depth'].shape == (B, H, W)
    assert outputs['prob_volume'].shape == (B, D, H, W)
    assert outputs['photometric_confidence'].shape == (B, H, W)
    assert outputs['prob_volume_pre'].shape == (B, D, H, W)
    assert outputs['sim_depth'].shape == (B, H, W)
    assert bool(jnp.all(jnp.isfinite(outputs['depth'])))
    print("KERNEL_OK")
</pallas_src>

<mosaic_0001>
module attributes {stable_mosaic.version = 11 : i64} {
  func.func @_stagenet_kernel(%arg0: i32, %arg1: i32, %arg2: memref<1x4x2x256xbf16, #tpu.memory_space<vmem>>, %arg3: memref<1x8x16x256xbf16, #tpu.memory_space<vmem>>, %arg4: memref<2x8xf32, #tpu.memory_space<smem>>, %arg5: memref<5xf32, #tpu.memory_space<smem>>, %arg6: memref<1x8x256xf32, #tpu.memory_space<vmem>>, %arg7: memref<1x8x256xf32, #tpu.memory_space<vmem>>, %arg8: memref<1x1x256xf32, #tpu.memory_space<vmem>>, %arg9: memref<1x1x256xf32, #tpu.memory_space<vmem>>, %arg10: memref<1x1x256xf32, #tpu.memory_space<vmem>>) attributes {dimension_semantics = [#tpu.dimension_semantics<parallel>, #tpu.dimension_semantics<parallel>], iteration_bounds = array<i64: 2, 1>, scalar_prefetch = 0 : i64, scratch_operands = 0 : i64, tpu.core_type = #tpu.core_type<tc>, window_params = [{transform_indices = @transform_0, window_bounds = array<i64: 1, 4, 2, 256>}, {transform_indices = @transform_1, window_bounds = array<i64: 1, 8, 16, 256>}, {transform_indices = @transform_2, window_bounds = array<i64: 2, 8>}, {transform_indices = @transform_3, window_bounds = array<i64: 5>}, {transform_indices = @transform_4, window_bounds = array<i64: 1, 8, 256>}, {transform_indices = @transform_5, window_bounds = array<i64: 1, 8, 256>}, {transform_indices = @transform_6, window_bounds = array<i64: 1, 1, 256>}, {transform_indices = @transform_7, window_bounds = array<i64: 1, 1, 256>}, {transform_indices = @transform_8, window_bounds = array<i64: 1, 1, 256>}]} {
    %c0 = arith.constant 0 : index
    %c0_0 = arith.constant 0 : index
    %c0_1 = arith.constant 0 : index
    %c0_2 = arith.constant 0 : index
    %0 = vector.load %arg2[%c0, %c0_0, %c0_1, %c0_2] : memref<1x4x2x256xbf16, #tpu.memory_space<vmem>>, vector<1x1x2x256xbf16>
    %1 = vector.shape_cast %0 : vector<1x1x2x256xbf16> to vector<2x256xbf16>
    %2 = arith.extf %1 : vector<2x256xbf16> to vector<2x256xf32>
    %3 = arith.mulf %2, %2 : vector<2x256xf32>
    %c0_3 = arith.constant 0 : index
    %c1 = arith.constant 1 : index
    %c0_4 = arith.constant 0 : index
    %c0_5 = arith.constant 0 : index
    %4 = vector.load %arg2[%c0_3, %c1, %c0_4, %c0_5] : memref<1x4x2x256xbf16, #tpu.memory_space<vmem>>, vector<1x1x2x256xbf16>
    %5 = vector.shape_cast %4 : vector<1x1x2x256xbf16> to vector<2x256xbf16>
    %6 = arith.extf %5 : vector<2x256xbf16> to vector<2x256xf32>
    %7 = arith.mulf %6, %6 : vector<2x256xf32>
    %8 = arith.addf %3, %7 : vector<2x256xf32>
    %c0_6 = arith.constant 0 : index
    %c2 = arith.constant 2 : index
    %c0_7 = arith.constant 0 : index
    %c0_8 = arith.constant 0 : index
    %9 = vector.load %arg2[%c0_6, %c2, %c0_7, %c0_8] : memref<1x4x2x256xbf16, #tpu.memory_space<vmem>>, vector<1x1x2x256xbf16>
    %10 = vector.shape_cast %9 : vector<1x1x2x256xbf16> to vector<2x256xbf16>
    %11 = arith.extf %10 : vector<2x256xbf16> to vector<2x256xf32>
    %12 = arith.mulf %11, %11 : vector<2x256xf32>
    %13 = arith.addf %8, %12 : vector<2x256xf32>
    %c0_9 = arith.constant 0 : index
    %c3 = arith.constant 3 : index
    %c0_10 = arith.constant 0 : index
    %c0_11 = arith.constant 0 : index
    %14 = vector.load %arg2[%c0_9, %c3, %c0_10, %c0_11] : memref<1x4x2x256xbf16, #tpu.memory_space<vmem>>, vector<1x1x2x256xbf16>
    %15 = vector.shape_cast %14 : vector<1x1x2x256xbf16> to vector<2x256xbf16>
    %16 = arith.extf %15 : vector<2x256xbf16> to vector<2x256xf32>
    %17 = arith.mulf %16, %16 : vector<2x256xf32>
    %18 = arith.addf %13, %17 : vector<2x256xf32>
    %cst = arith.constant 1.000000e-24 : f32
    %19 = vector.broadcast %cst : f32 to vector<2x256xf32>
    %20 = arith.maximumf %18, %19 : vector<2x256xf32>
    %21 = math.rsqrt %20 : vector<2x256xf32>
    %cst_12 = arith.constant 0.000000e+00 : f32
    %22 = vector.broadcast %cst_12 : f32 to vector<8x256xf32>
    %cst_13 = arith.constant 0.000000e+00 : f32
    %23 = vector.broadcast %cst_13 : f32 to vector<8x256xf32>
    %cst_14 = arith.constant 0.000000e+00 : f32
    %24 = vector.broadcast %cst_14 : f32 to vector<8x256xf32>
    %c0_15 = arith.constant 0 : index
    %c0_16 = arith.constant 0 : index
    %c0_17 = arith.constant 0 : index
    %c0_18 = arith.constant 0 : index
    %25 = vector.load %arg3[%c0_15, %c0_16, %c0_17, %c0_18] : memref<1x8x16x256xbf16, #tpu.memory_space<vmem>>, vector<1x1x16x256xbf16>
    %26 = vector.shape_cast %25 : vector<1x1x16x256xbf16> to vector<16x256xbf16>
    %27 = arith.extf %26 : vector<16x256xbf16> to vector<16x256xf32>
    %28 = vector.shape_cast %27 : vector<16x256xf32> to vector<2x8x256xf32>
    %c0_19 = arith.constant 0 : index
    %c0_20 = arith.constant 0 : index
    %c0_21 = arith.constant 0 : index
    %c0_22 = arith.constant 0 : index
    %29 = vector.load %arg2[%c0_19, %c0_20, %c0_21, %c0_22] : memref<1x4x2x256xbf16, #tpu.memory_space<vmem>>, vector<1x1x2x256xbf16>
    %30 = vector.shape_cast %29 : vector<1x1x2x256xbf16> to vector<2x256xbf16>
    %31 = arith.extf %30 : vector<2x256xbf16> to vector<2x256xf32>
    %32 = vector.shape_cast %31 : vector<2x256xf32> to vector<2x1x256xf32>
    %33 = vector.broadcast %32 : vector<2x1x256xf32> to vector<2x8x256xf32>
    %34 = arith.mulf %33, %28 : vector<2x8x256xf32>
    %35 = arith.mulf %28, %28 : vector<2x8x256xf32>
    %cst_23 = arith.constant dense<0.000000e+00> : vector<8x256xf32>
    %36 = vector.multi_reduction <add>, %34, %cst_23 [0] : vector<2x8x256xf32> to vector<8x256xf32>
    %c0_24 = arith.constant 0 : index
    %37 = memref.load %arg5[%c0_24] : memref<5xf32, #tpu.memory_space<smem>>
    %cst_25 = arith.constant 5.000000e-01 : f32
    %38 = arith.mulf %37, %cst_25 : f32
    %39 = vector.broadcast %38 : f32 to vector<8x256xf32>
    %40 = arith.mulf %36, %39 : vector<8x256xf32>
    %c0_26 = arith.constant 0 : index
    %c1_27 = arith.constant 1 : index
    %c0_28 = arith.constant 0 : index
    %c0_29 = arith.constant 0 : index
    %41 = vector.load %arg3[%c0_26, %c1_27, %c0_28, %c0_29] : memref<1x8x16x256xbf16, #tpu.memory_space<vmem>>, vector<1x1x16x256xbf16>
    %42 = vector.shape_cast %41 : vector<1x1x16x256xbf16> to vector<16x256xbf16>
    %43 = arith.extf %42 : vector<16x256xbf16> to vector<16x256xf32>
    %44 = vector.shape_cast %43 : vector<16x256xf32> to vector<2x8x256xf32>
    %c0_30 = arith.constant 0 : index
    %c1_31 = arith.constant 1 : index
    %c0_32 = arith.constant 0 : index
    %c0_33 = arith.constant 0 : index
    %45 = vector.load %arg2[%c0_30, %c1_31, %c0_32, %c0_33] : memref<1x4x2x256xbf16, #tpu.memory_space<vmem>>, vector<1x1x2x256xbf16>
    %46 = vector.shape_cast %45 : vector<1x1x2x256xbf16> to vector<2x256xbf16>
    %47 = arith.extf %46 : vector<2x256xbf16> to vector<2x256xf32>
    %48 = vector.shape_cast %47 : vector<2x256xf32> to vector<2x1x256xf32>
    %49 = vector.broadcast %48 : vector<2x1x256xf32> to vector<2x8x256xf32>
    %50 = arith.mulf %49, %44 : vector<2x8x256xf32>
    %51 = arith.addf %34, %50 : vector<2x8x256xf32>
    %52 = arith.mulf %44, %44 : vector<2x8x256xf32>
    %53 = arith.addf %35, %52 : vector<2x8x256xf32>
    %cst_34 = arith.constant dense<0.000000e+00> : vector<8x256xf32>
    %54 = vector.multi_reduction <add>, %50, %cst_34 [0] : vector<2x8x256xf32> to vector<8x256xf32>
    %55 = arith.addf %36, %54 : vector<8x256xf32>
    %c1_35 = arith.constant 1 : index
    %56 = memref.load %arg5[%c1_35] : memref<5xf32, #tpu.memory_space<smem>>
    %cst_36 = arith.constant 5.000000e-01 : f32
    %57 = arith.mulf %56, %cst_36 : f32
    %58 = vector.broadcast %57 : f32 to vector<8x256xf32>
    %59 = arith.mulf %54, %58 : vector<8x256xf32>
    %60 = arith.addf %40, %59 : vector<8x256xf32>
    %c0_37 = arith.constant 0 : index
    %c2_38 = arith.constant 2 : index
    %c0_39 = arith.constant 0 : index
    %c0_40 = arith.constant 0 : index
    %61 = vector.load %arg3[%c0_37, %c2_38, %c0_39, %c0_40] : memref<1x8x16x256xbf16, #tpu.memory_space<vmem>>, vector<1x1x16x256xbf16>
    %62 = vector.shape_cast %61 : vector<1x1x16x256xbf16> to vector<16x256xbf16>
    %63 = arith.extf %62 : vector<16x256xbf16> to vector<16x256xf32>
    %64 = vector.shape_cast %63 : vector<16x256xf32> to vector<2x8x256xf32>
    %c0_41 = arith.constant 0 : index
    %c2_42 = arith.constant 2 : index
    %c0_43 = arith.constant 0 : index
    %c0_44 = arith.constant 0 : index
    %65 = vector.load %arg2[%c0_41, %c2_42, %c0_43, %c0_44] : memref<1x4x2x256xbf16, #tpu.memory_space<vmem>>, vector<1x1x2x256xbf16>
    %66 = vector.shape_cast %65 : vector<1x1x2x256xbf16> to vector<2x256xbf16>
    %67 = arith.extf %66 : vector<2x256xbf16> to vector<2x256xf32>
    %68 = vector.shape_cast %67 : vector<2x256xf32> to vector<2x1x256xf32>
    %69 = vector.broadcast %68 : vector<2x1x256xf32> to vector<2x8x256xf32>
    %70 = arith.mulf %69, %64 : vector<2x8x256xf32>
    %71 = arith.addf %51, %70 : vector<2x8x256xf32>
    %72 = arith.mulf %64, %64 : vector<2x8x256xf32>
    %73 = arith.addf %53, %72 : vector<2x8x256xf32>
    %cst_45 = arith.constant dense<0.000000e+00> : vector<8x256xf32>
    %74 = vector.multi_reduction <add>, %70, %cst_45 [0] : vector<2x8x256xf32> to vector<8x256xf32>
    %75 = arith.addf %55, %74 : vector<8x256xf32>
    %c2_46 = arith.constant 2 : index
    %76 = memref.load %arg5[%c2_46] : memref<5xf32, #tpu.memory_space<smem>>
    %cst_47 = arith.constant 5.000000e-01 : f32
    %77 = arith.mulf %76, %cst_47 : f32
    %78 = vector.broadcast %77 : f32 to vector<8x256xf32>
    %79 = arith.mulf %74, %78 : vector<8x256xf32>
    %80 = arith.addf %60, %79 : vector<8x256xf32>
    %c0_48 = arith.constant 0 : index
    %c3_49 = arith.constant 3 : index
    %c0_50 = arith.constant 0 : index
    %c0_51 = arith.constant 0 : index
    %81 = vector.load %arg3[%c0_48, %c3_49, %c0_50, %c0_51] : memref<1x8x16x256xbf16, #tpu.memory_space<vmem>>, vector<1x1x16x256xbf16>
    %82 = vector.shape_cast %81 : vector<1x1x16x256xbf16> to vector<16x256xbf16>
    %83 = arith.extf %82 : vector<16x256xbf16> to vector<16x256xf32>
    %84 = vector.shape_cast %83 : vector<16x256xf32> to vector<2x8x256xf32>
    %c0_52 = arith.constant 0 : index
    %c3_53 = arith.constant 3 : index
    %c0_54 = arith.constant 0 : index
    %c0_55 = arith.constant 0 : index
    %85 = vector.load %arg2[%c0_52, %c3_53, %c0_54, %c0_55] : memref<1x4x2x256xbf16, #tpu.memory_space<vmem>>, vector<1x1x2x256xbf16>
    %86 = vector.shape_cast %85 : vector<1x1x2x256xbf16> to vector<2x256xbf16>
    %87 = arith.extf %86 : vector<2x256xbf16> to vector<2x256xf32>
    %88 = vector.shape_cast %87 : vector<2x256xf32> to vector<2x1x256xf32>
    %89 = vector.broadcast %88 : vector<2x1x256xf32> to vector<2x8x256xf32>
    %90 = arith.mulf %89, %84 : vector<2x8x256xf32>
    %91 = arith.addf %71, %90 : vector<2x8x256xf32>
    %92 = arith.mulf %84, %84 : vector<2x8x256xf32>
    %93 = arith.addf %73, %92 : vector<2x8x256xf32>
    %cst_56 = arith.constant dense<0.000000e+00> : vector<8x256xf32>
    %94 = vector.multi_reduction <add>, %90, %cst_56 [0] : vector<2x8x256xf32> to vector<8x256xf32>
    %95 = arith.addf %75, %94 : vector<8x256xf32>
    %c3_57 = arith.constant 3 : index
    %96 = memref.load %arg5[%c3_57] : memref<5xf32, #tpu.memory_space<smem>>
    %cst_58 = arith.constant 5.000000e-01 : f32
    %97 = arith.mulf %96, %cst_58 : f32
    %98 = vector.broadcast %97 : f32 to vector<8x256xf32>
    %99 = arith.mulf %94, %98 : vector<8x256xf32>
    %100 = arith.addf %80, %99 : vector<8x256xf32>
    %cst_59 = arith.constant 2.500000e-01 : f32
    %101 = vector.broadcast %cst_59 : f32 to vector<8x256xf32>
    %102 = arith.mulf %95, %101 : vector<8x256xf32>
    %cst_60 = arith.constant dense<0xFF800000> : vector<256xf32>
    %103 = vector.multi_reduction <maximumf>, %102, %cst_60 [0] : vector<8x256xf32> to vector<256xf32>
    %104 = vector.shape_cast %103 : vector<256xf32> to vector<1x256xf32>
    %105 = vector.broadcast %104 : vector<1x256xf32> to vector<8x256xf32>
    %106 = arith.subf %102, %105 : vector<8x256xf32>
    %107 = math.exp %106 : vector<8x256xf32>
    %cst_61 = arith.constant dense<0.000000e+00> : vector<256xf32>
    %108 = vector.multi_reduction <add>, %107, %cst_61 [0] : vector<8x256xf32> to vector<256xf32>
    %109 = vector.shape_cast %108 : vector<256xf32> to vector<1x256xf32>
    %110 = tpu.reciprocal %109 {approx = true} : vector<1x256xf32> -> vector<1x256xf32>
    %cst_62 = arith.constant 0.353553385 : f32
    %111 = vector.broadcast %cst_62 : f32 to vector<1x256xf32>
    %112 = arith.mulf %110, %111 : vector<1x256xf32>
    %113 = vector.broadcast %112 : vector<1x256xf32> to vector<8x256xf32>
    %114 = arith.mulf %107, %113 : vector<8x256xf32>
    %115 = arith.mulf %100, %114 : vector<8x256xf32>
    %116 = arith.addf %22, %115 : vector<8x256xf32>
    %117 = arith.addf %23, %114 : vector<8x256xf32>
    %cst_63 = arith.constant 1.000000e-24 : f32
    %118 = vector.broadcast %cst_63 : f32 to vector<2x8x256xf32>
    %119 = arith.maximumf %93, %118 : vector<2x8x256xf32>
    %120 = math.rsqrt %119 : vector<2x8x256xf32>
    %121 = vector.shape_cast %21 : vector<2x256xf32> to vector<2x1x256xf32>
    %122 = vector.broadcast %121 : vector<2x1x256xf32> to vector<2x8x256xf32>
    %123 = arith.mulf %120, %122 : vector<2x8x256xf32>
    %124 = arith.mulf %91, %123 : vector<2x8x256xf32>
    %cst_64 = arith.constant dense<0.000000e+00> : vector<8x256xf32>
    %125 = vector.multi_reduction <add>, %124, %cst_64 [0] : vector<2x8x256xf32> to vector<8x256xf32>
    %126 = arith.addf %24, %125 : vector<8x256xf32>
    %c0_65 = arith.constant 0 : index
    %c4 = arith.constant 4 : index
    %c0_66 = arith.constant 0 : index
    %c0_67 = arith.constant 0 : index
    %127 = vector.load %arg3[%c0_65, %c4, %c0_66, %c0_67] : memref<1x8x16x256xbf16, #tpu.memory_space<vmem>>, vector<1x1x16x256xbf16>
    %128 = vector.shape_cast %127 : vector<1x1x16x256xbf16> to vector<16x256xbf16>
    %129 = arith.extf %128 : vector<16x256xbf16> to vector<16x256xf32>
    %130 = vector.shape_cast %129 : vector<16x256xf32> to vector<2x8x256xf32>
    %c0_68 = arith.constant 0 : index
    %c0_69 = arith.constant 0 : index
    %c0_70 = arith.constant 0 : index
    %c0_71 = arith.constant 0 : index
    %131 = vector.load %arg2[%c0_68, %c0_69, %c0_70, %c0_71] : memref<1x4x2x256xbf16, #tpu.memory_space<vmem>>, vector<1x1x2x256xbf16>
    %132 = vector.shape_cast %131 : vector<1x1x2x256xbf16> to vector<2x256xbf16>
    %133 = arith.extf %132 : vector<2x256xbf16> to vector<2x256xf32>
    %134 = vector.shape_cast %133 : vector<2x256xf32> to vector<2x1x256xf32>
    %135 = vector.broadcast %134 : vector<2x1x256xf32> to vector<2x8x256xf32>
    %136 = arith.mulf %135, %130 : vector<2x8x256xf32>
    %137 = arith.mulf %130, %130 : vector<2x8x256xf32>
    %cst_72 = arith.constant dense<0.000000e+00> : vector<8x256xf32>
    %138 = vector.multi_reduction <add>, %136, %cst_72 [0] : vector<2x8x256xf32> to vector<8x256xf32>
    %c0_73 = arith.constant 0 : index
    %139 = memref.load %arg5[%c0_73] : memref<5xf32, #tpu.memory_space<smem>>
    %cst_74 = arith.constant 5.000000e-01 : f32
    %140 = arith.mulf %139, %cst_74 : f32
    %141 = vector.broadcast %140 : f32 to vector<8x256xf32>
    %142 = arith.mulf %138, %141 : vector<8x256xf32>
    %c0_75 = arith.constant 0 : index
    %c5 = arith.constant 5 : index
    %c0_76 = arith.constant 0 : index
    %c0_77 = arith.constant 0 : index
    %143 = vector.load %arg3[%c0_75, %c5, %c0_76, %c0_77] : memref<1x8x16x256xbf16, #tpu.memory_space<vmem>>, vector<1x1x16x256xbf16>
    %144 = vector.shape_cast %143 : vector<1x1x16x256xbf16> to vector<16x256xbf16>
    %145 = arith.extf %144 : vector<16x256xbf16> to vector<16x256xf32>
    %146 = vector.shape_cast %145 : vector<16x256xf32> to vector<2x8x256xf32>
    %c0_78 = arith.constant 0 : index
    %c1_79 = arith.constant 1 : index
    %c0_80 = arith.constant 0 : index
    %c0_81 = arith.constant 0 : index
    %147 = vector.load %arg2[%c0_78, %c1_79, %c0_80, %c0_81] : memref<1x4x2x256xbf16, #tpu.memory_space<vmem>>, vector<1x1x2x256xbf16>
    %148 = vector.shape_cast %147 : vector<1x1x2x256xbf16> to vector<2x256xbf16>
    %149 = arith.extf %148 : vector<2x256xbf16> to vector<2x256xf32>
    %150 = vector.shape_cast %149 : vector<2x256xf32> to vector<2x1x256xf32>
    %151 = vector.broadcast %150 : vector<2x1x256xf32> to vector<2x8x256xf32>
    %152 = arith.mulf %151, %146 : vector<2x8x256xf32>
    %153 = arith.addf %136, %152 : vector<2x8x256xf32>
    %154 = arith.mulf %146, %146 : vector<2x8x256xf32>
    %155 = arith.addf %137, %154 : vector<2x8x256xf32>
    %cst_82 = arith.constant dense<0.000000e+00> : vector<8x256xf32>
    %156 = vector.multi_reduction <add>, %152, %cst_82 [0] : vector<2x8x256xf32> to vector<8x256xf32>
    %157 = arith.addf %138, %156 : vector<8x256xf32>
    %c1_83 = arith.constant 1 : index
    %158 = memref.load %arg5[%c1_83] : memref<5xf32, #tpu.memory_space<smem>>
    %cst_84 = arith.constant 5.000000e-01 : f32
    %159 = arith.mulf %158, %cst_84 : f32
    %160 = vector.broadcast %159 : f32 to vector<8x256xf32>
    %161 = arith.mulf %156, %160 : vector<8x256xf32>
    %162 = arith.addf %142, %161 : vector<8x256xf32>
    %c0_85 = arith.constant 0 : index
    %c6 = arith.constant 6 : index
    %c0_86 = arith.constant 0 : index
    %c0_87 = arith.constant 0 : index
    %163 = vector.load %arg3[%c0_85, %c6, %c0_86, %c0_87] : memref<1x8x16x256xbf16, #tpu.memory_space<vmem>>, vector<1x1x16x256xbf16>
    %164 = vector.shape_cast %163 : vector<1x1x16x256xbf16> to vector<16x256xbf16>
    %165 = arith.extf %164 : vector<16x256xbf16> to vector<16x256xf32>
    %166 = vector.shape_cast %165 : vector<16x256xf32> to vector<2x8x256xf32>
    %c0_88 = arith.constant 0 : index
    %c2_89 = arith.constant 2 : index
    %c0_90 = arith.constant 0 : index
    %c0_91 = arith.constant 0 : index
    %167 = vector.load %arg2[%c0_88, %c2_89, %c0_90, %c0_91] : memref<1x4x2x256xbf16, #tpu.memory_space<vmem>>, vector<1x1x2x256xbf16>
    %168 = vector.shape_cast %167 : vector<1x1x2x256xbf16> to vector<2x256xbf16>
    %169 = arith.extf %168 : vector<2x256xbf16> to vector<2x256xf32>
    %170 = vector.shape_cast %169 : vector<2x256xf32> to vector<2x1x256xf32>
    %171 = vector.broadcast %170 : vector<2x1x256xf32> to vector<2x8x256xf32>
    %172 = arith.mulf %171, %166 : vector<2x8x256xf32>
    %173 = arith.addf %153, %172 : vector<2x8x256xf32>
    %174 = arith.mulf %166, %166 : vector<2x8x256xf32>
    %175 = arith.addf %155, %174 : vector<2x8x256xf32>
    %cst_92 = arith.constant dense<0.000000e+00> : vector<8x256xf32>
    %176 = vector.multi_reduction <add>, %172, %cst_92 [0] : vector<2x8x256xf32> to vector<8x256xf32>
    %177 = arith.addf %157, %176 : vector<8x256xf32>
    %c2_93 = arith.constant 2 : index
    %178 = memref.load %arg5[%c2_93] : memref<5xf32, #tpu.memory_space<smem>>
    %cst_94 = arith.constant 5.000000e-01 : f32
    %179 = arith.mulf %178, %cst_94 : f32
    %180 = vector.broadcast %179 : f32 to vector<8x256xf32>
    %181 = arith.mulf %176, %180 : vector<8x256xf32>
    %182 = arith.addf %162, %181 : vector<8x256xf32>
    %c0_95 = arith.constant 0 : index
    %c7 = arith.constant 7 : index
    %c0_96 = arith.constant 0 : index
    %c0_97 = arith.constant 0 : index
    %183 = vector.load %arg3[%c0_95, %c7, %c0_96, %c0_97] : memref<1x8x16x256xbf16, #tpu.memory_space<vmem>>, vector<1x1x16x256xbf16>
    %184 = vector.shape_cast %183 : vector<1x1x16x256xbf16> to vector<16x256xbf16>
    %185 = arith.extf %184 : vector<16x256xbf16> to vector<16x256xf32>
    %186 = vector.shape_cast %185 : vector<16x256xf32> to vector<2x8x256xf32>
    %c0_98 = arith.constant 0 : index
    %c3_99 = arith.constant 3 : index
    %c0_100 = arith.constant 0 : index
    %c0_101 = arith.constant 0 : index
    %187 = vector.load %arg2[%c0_98, %c3_99, %c0_100, %c0_101] : memref<1x4x2x256xbf16, #tpu.memory_space<vmem>>, vector<1x1x2x256xbf16>
    %188 = vector.shape_cast %187 : vector<1x1x2x256xbf16> to vector<2x256xbf16>
    %189 = arith.extf %188 : vector<2x256xbf16> to vector<2x256xf32>
    %190 = vector.shape_cast %189 : vector<2x256xf32> to vector<2x1x256xf32>
    %191 = vector.broadcast %190 : vector<2x1x256xf32> to vector<2x8x256xf32>
    %192 = arith.mulf %191, %186 : vector<2x8x256xf32>
    %193 = arith.addf %173, %192 : vector<2x8x256xf32>
    %194 = arith.mulf %186, %186 : vector<2x8x256xf32>
    %195 = arith.addf %175, %194 : vector<2x8x256xf32>
    %cst_102 = arith.constant dense<0.000000e+00> : vector<8x256xf32>
    %196 = vector.multi_reduction <add>, %192, %cst_102 [0] : vector<2x8x256xf32> to vector<8x256xf32>
    %197 = arith.addf %177, %196 : vector<8x256xf32>
    %c3_103 = arith.constant 3 : index
    %198 = memref.load %arg5[%c3_103] : memref<5xf32, #tpu.memory_space<smem>>
    %cst_104 = arith.constant 5.000000e-01 : f32
    %199 = arith.mulf %198, %cst_104 : f32
    %200 = vector.broadcast %199 : f32 to vector<8x256xf32>
    %201 = arith.mulf %196, %200 : vector<8x256xf32>
    %202 = arith.addf %182, %201 : vector<8x256xf32>
    %cst_105 = arith.constant 2.500000e-01 : f32
    %203 = vector.broadcast %cst_105 : f32 to vector<8x256xf32>
    %204 = arith.mulf %197, %203 : vector<8x256xf32>
    %cst_106 = arith.constant dense<0xFF800000> : vector<256xf32>
    %205 = vector.multi_reduction <maximumf>, %204, %cst_106 [0] : vector<8x256xf32> to vector<256xf32>
    %206 = vector.shape_cast %205 : vector<256xf32> to vector<1x256xf32>
    %207 = vector.broadcast %206 : vector<1x256xf32> to vector<8x256xf32>
    %208 = arith.subf %204, %207 : vector<8x256xf32>
    %209 = math.exp %208 : vector<8x256xf32>
    %cst_107 = arith.constant dense<0.000000e+00> : vector<256xf32>
    %210 = vector.multi_reduction <add>, %209, %cst_107 [0] : vector<8x256xf32> to vector<256xf32>
    %211 = vector.shape_cast %210 : vector<256xf32> to vector<1x256xf32>
    %212 = tpu.reciprocal %211 {approx = true} : vector<1x256xf32> -> vector<1x256xf32>
    %cst_108 = arith.constant 0.353553385 : f32
    %213 = vector.broadcast %cst_108 : f32 to vector<1x256xf32>
    %214 = arith.mulf %212, %213 : vector<1x256xf32>
    %215 = vector.broadcast %214 : vector<1x256xf32> to vector<8x256xf32>
    %216 = arith.mulf %209, %215 : vector<8x256xf32>
    %217 = arith.mulf %202, %216 : vector<8x256xf32>
    %218 = arith.addf %116, %217 : vector<8x256xf32>
    %219 = arith.addf %117, %216 : vector<8x256xf32>
    %cst_109 = arith.constant 1.000000e-24 : f32
    %220 = vector.broadcast %cst_109 : f32 to vector<2x8x256xf32>
    %221 = arith.maximumf %195, %220 : vector<2x8x256xf32>
    %222 = math.rsqrt %221 : vector<2x8x256xf32>
    %223 = vector.shape_cast %21 : vector<2x256xf32> to vector<2x1x256xf32>
    %224 = vector.broadcast %223 : vector<2x1x256xf32> to vector<2x8x256xf32>
    %225 = arith.mulf %222, %224 : vector<2x8x256xf32>
    %226 = arith.mulf %193, %225 : vector<2x8x256xf32>
    %cst_110 = arith.constant dense<0.000000e+00> : vector<8x256xf32>
    %227 = vector.multi_reduction <add>, %226, %cst_110 [0] : vector<2x8x256xf32> to vector<8x256xf32>
    %228 = arith.addf %126, %227 : vector<8x256xf32>
    %cst_111 = arith.constant 9.99999997E-7 : f32
    %229 = vector.broadcast %cst_111 : f32 to vector<8x256xf32>
    %230 = arith.addf %219, %229 : vector<8x256xf32>
    %231 = arith.divf %218, %230 : vector<8x256xf32>
    %c4_112 = arith.constant 4 : index
    %232 = memref.load %arg5[%c4_112] : memref<5xf32, #tpu.memory_space<smem>>
    %233 = vector.broadcast %232 : f32 to vector<8x256xf32>
    %234 = arith.addf %231, %233 : vector<8x256xf32>
    %c0_113 = arith.constant 0 : index
    %c0_114 = arith.constant 0 : index
    %c0_115 = arith.constant 0 : index
    %235 = vector.load %arg6[%c0_113, %c0_114, %c0_115] : memref<1x8x256xf32, #tpu.memory_space<vmem>>, vector<1x8x256xf32>
    %236 = vector.shape_cast %235 : vector<1x8x256xf32> to vector<8x256xf32>
    %237 = vector.shape_cast %234 : vector<8x256xf32> to vector<1x8x256xf32>
    tpu.vector_store %arg6[%c0_113, %c0_114, %c0_115], %237 {strides = array<i32>} : memref<1x8x256xf32, #tpu.memory_space<vmem>>, vector<1x8x256xf32>,
    %cst_116 = arith.constant dense<0xFF800000> : vector<256xf32>
    %238 = vector.multi_reduction <maximumf>, %234, %cst_116 [0] : vector<8x256xf32> to vector<256xf32>
    %239 = vector.shape_cast %238 : vector<256xf32> to vector<1x256xf32>
    %240 = vector.broadcast %239 : vector<1x256xf32> to vector<8x256xf32>
    %241 = arith.subf %234, %240 : vector<8x256xf32>
    %242 = math.exp %241 : vector<8x256xf32>
    %cst_117 = arith.constant dense<0.000000e+00> : vector<256xf32>
    %243 = vector.multi_reduction <add>, %242, %cst_117 [0] : vector<8x256xf32> to vector<256xf32>
    %244 = vector.shape_cast %243 : vector<256xf32> to vector<1x256xf32>
    %cst_118 = arith.constant 1.000000e+00 : f32
    %245 = vector.broadcast %cst_118 : f32 to vector<1x256xf32>
    %246 = arith.divf %245, %244 : vector<1x256xf32>
    %247 = vector.broadcast %246 : vector<1x256xf32> to vector<8x256xf32>
    %248 = arith.mulf %242, %247 : vector<8x256xf32>
    %c0_119 = arith.constant 0 : index
    %c0_120 = arith.constant 0 : index
    %c0_121 = arith.constant 0 : index
    %249 = vector.load %arg7[%c0_119, %c0_120, %c0_121] : memref<1x8x256xf32, #tpu.memory_space<vmem>>, vector<1x8x256xf32>
    %250 = vector.shape_cast %249 : vector<1x8x256xf32> to vector<8x256xf32>
    %251 = vector.shape_cast %248 : vector<8x256xf32> to vector<1x8x256xf32>
    tpu.vector_store %arg7[%c0_119, %c0_120, %c0_121], %251 {strides = array<i32>} : memref<1x8x256xf32, #tpu.memory_space<vmem>>, vector<1x8x256xf32>,
    %c0_122 = arith.constant 0 : index
    %c0_123 = arith.constant 0 : index
    %c0_124 = arith.constant 0 : index
    %252 = vector.load %arg9[%c0_122, %c0_123, %c0_124] : memref<1x1x256xf32, #tpu.memory_space<vmem>>, vector<1x1x256xf32>
    %253 = vector.shape_cast %252 : vector<1x1x256xf32> to vector<1x256xf32>
    %254 = vector.shape_cast %246 : vector<1x256xf32> to vector<1x1x256xf32>
    tpu.vector_store %arg9[%c0_122, %c0_123, %c0_124], %254 {strides = array<i32>} : memref<1x1x256xf32, #tpu.memory_space<vmem>>, vector<1x1x256xf32>,
    %255 = arith.mulf %242, %242 : vector<8x256xf32>
    %cst_125 = arith.constant dense<0.000000e+00> : vector<256xf32>
    %256 = vector.multi_reduction <add>, %255, %cst_125 [0] : vector<8x256xf32> to vector<256xf32>
    %257 = vector.shape_cast %256 : vector<256xf32> to vector<1x256xf32>
    %cst_126 = arith.constant 1.000000e+00 : f32
    %258 = vector.broadcast %cst_126 : f32 to vector<1x256xf32>
    %259 = arith.divf %258, %257 : vector<1x256xf32>
    %cst_127 = arith.constant 0.000000e+00 : f32
    %260 = vector.broadcast %cst_127 : f32 to vector<1x256xf32>
    %261 = vector.extract_strided_slice %255 {offsets = [0, 0], sizes = [1, 256], strides = [1, 1]} : vector<8x256xf32> to vector<1x256xf32>
    %262 = arith.index_cast %arg0 : i32 to index
    %c0_128 = arith.constant 0 : index
    %263 = memref.load %arg4[%262, %c0_128] : memref<2x8xf32, #tpu.memory_space<smem>>
    %264 = vector.broadcast %263 : f32 to vector<1x256xf32>
    %265 = arith.mulf %261, %264 : vector<1x256xf32>
    %266 = arith.addf %260, %265 : vector<1x256xf32>
    %267 = vector.extract_strided_slice %255 {offsets = [1, 0], sizes = [1, 256], strides = [1, 1]} : vector<8x256xf32> to vector<1x256xf32>
    %268 = arith.index_cast %arg0 : i32 to index
    %c1_129 = arith.constant 1 : index
    %269 = memref.load %arg4[%268, %c1_129] : memref<2x8xf32, #tpu.memory_space<smem>>
    %270 = vector.broadcast %269 : f32 to vector<1x256xf32>
    %271 = arith.mulf %267, %270 : vector<1x256xf32>
    %272 = arith.addf %266, %271 : vector<1x256xf32>
    %273 = vector.extract_strided_slice %255 {offsets = [2, 0], sizes = [1, 256], strides = [1, 1]} : vector<8x256xf32> to vector<1x256xf32>
    %274 = arith.index_cast %arg0 : i32 to index
    %c2_130 = arith.constant 2 : index
    %275 = memref.load %arg4[%274, %c2_130] : memref<2x8xf32, #tpu.memory_space<smem>>
    %276 = vector.broadcast %275 : f32 to vector<1x256xf32>
    %277 = arith.mulf %273, %276 : vector<1x256xf32>
    %278 = arith.addf %272, %277 : vector<1x256xf32>
    %279 = vector.extract_strided_slice %255 {offsets = [3, 0], sizes = [1, 256], strides = [1, 1]} : vector<8x256xf32> to vector<1x256xf32>
    %280 = arith.index_cast %arg0 : i32 to index
    %c3_131 = arith.constant 3 : index
    %281 = memref.load %arg4[%280, %c3_131] : memref<2x8xf32, #tpu.memory_space<smem>>
    %282 = vector.broadcast %281 : f32 to vector<1x256xf32>
    %283 = arith.mulf %279, %282 : vector<1x256xf32>
    %284 = arith.addf %278, %283 : vector<1x256xf32>
    %285 = vector.extract_strided_slice %255 {offsets = [4, 0], sizes = [1, 256], strides = [1, 1]} : vector<8x256xf32> to vector<1x256xf32>
    %286 = arith.index_cast %arg0 : i32 to index
    %c4_132 = arith.constant 4 : index
    %287 = memref.load %arg4[%286, %c4_132] : memref<2x8xf32, #tpu.memory_space<smem>>
    %288 = vector.broadcast %287 : f32 to vector<1x256xf32>
    %289 = arith.mulf %285, %288 : vector<1x256xf32>
    %290 = arith.addf %284, %289 : vector<1x256xf32>
    %291 = vector.extract_strided_slice %255 {offsets = [5, 0], sizes = [1, 256], strides = [1, 1]} : vector<8x256xf32> to vector<1x256xf32>
    %292 = arith.index_cast %arg0 : i32 to index
    %c5_133 = arith.constant 5 : index
    %293 = memref.load %arg4[%292, %c5_133] : memref<2x8xf32, #tpu.memory_space<smem>>
    %294 = vector.broadcast %293 : f32 to vector<1x256xf32>
    %295 = arith.mulf %291, %294 : vector<1x256xf32>
    %296 = arith.addf %290, %295 : vector<1x256xf32>
    %297 = vector.extract_strided_slice %255 {offsets = [6, 0], sizes = [1, 256], strides = [1, 1]} : vector<8x256xf32> to vector<1x256xf32>
    %298 = arith.index_cast %arg0 : i32 to index
    %c6_134 = arith.constant 6 : index
    %299 = memref.load %arg4[%298, %c6_134] : memref<2x8xf32, #tpu.memory_space<smem>>
    %300 = vector.broadcast %299 : f32 to vector<1x256xf32>
    %301 = arith.mulf %297, %300 : vector<1x256xf32>
    %302 = arith.addf %296, %301 : vector<1x256xf32>
    %303 = vector.extract_strided_slice %255 {offsets = [7, 0], sizes = [1, 256], strides = [1, 1]} : vector<8x256xf32> to vector<1x256xf32>
    %304 = arith.index_cast %arg0 : i32 to index
    %c7_135 = arith.constant 7 : index
    %305 = memref.load %arg4[%304, %c7_135] : memref<2x8xf32, #tpu.memory_space<smem>>
    %306 = vector.broadcast %305 : f32 to vector<1x256xf32>
    %307 = arith.mulf %303, %306 : vector<1x256xf32>
    %308 = arith.addf %302, %307 : vector<1x256xf32>
    %309 = arith.mulf %308, %259 : vector<1x256xf32>
    %c0_136 = arith.constant 0 : index
    %c0_137 = arith.constant 0 : index
    %c0_138 = arith.constant 0 : index
    %310 = vector.load %arg8[%c0_136, %c0_137, %c0_138] : memref<1x1x256xf32, #tpu.memory_space<vmem>>, vector<1x1x256xf32>
    %311 = vector.shape_cast %310 : vector<1x1x256xf32> to vector<1x256xf32>
    %312 = vector.shape_cast %309 : vector<1x256xf32> to vector<1x1x256xf32>
    tpu.vector_store %arg8[%c0_136, %c0_137, %c0_138], %312 {strides = array<i32>} : memref<1x1x256xf32, #tpu.memory_space<vmem>>, vector<1x1x256xf32>,
    %cst_139 = arith.constant dense<0xFF800000> : vector<256xf32>
    %313 = vector.multi_reduction <maximumf>, %228, %cst_139 [0] : vector<8x256xf32> to vector<256xf32>
    %314 = vector.shape_cast %313 : vector<256xf32> to vector<1x256xf32>
    %315 = tpu.iota {dimensions = array<i32: 0>} : vector<8x256xi32>
    %316 = vector.broadcast %314 : vector<1x256xf32> to vector<8x256xf32>
    %317 = arith.cmpf oeq, %228, %316 : vector<8x256xf32>
    %c8_i32 = arith.constant 8 : i32
    %318 = vector.broadcast %c8_i32 : i32 to vector<8x256xi32>
    %319 = arith.select %317, %315, %318 : vector<8x256xi1>, vector<8x256xi32>
    %cst_140 = arith.constant dense<2147483647> : vector<256xi32>
    %320 = vector.multi_reduction <minsi>, %319, %cst_140 [0] : vector<8x256xi32> to vector<256xi32>
    %321 = vector.shape_cast %320 : vector<256xi32> to vector<1x256xi32>
    %cst_141 = arith.constant 0.000000e+00 : f32
    %322 = vector.broadcast %cst_141 : f32 to vector<1x256xf32>
    %c0_i32 = arith.constant 0 : i32
    %323 = vector.broadcast %c0_i32 : i32 to vector<1x256xi32>
    %324 = arith.cmpi eq, %321, %323 : vector<1x256xi32>
    %325 = arith.index_cast %arg0 : i32 to index
    %c0_142 = arith.constant 0 : index
    %326 = memref.load %arg4[%325, %c0_142] : memref<2x8xf32, #tpu.memory_space<smem>>
    %327 = vector.broadcast %326 : f32 to vector<1x256xf32>
    %328 = arith.select %324, %327, %322 : vector<1x256xi1>, vector<1x256xf32>
    %c1_i32 = arith.constant 1 : i32
    %329 = vector.broadcast %c1_i32 : i32 to vector<1x256xi32>
    %330 = arith.cmpi eq, %321, %329 : vector<1x256xi32>
    %331 = arith.index_cast %arg0 : i32 to index
    %c1_143 = arith.constant 1 : index
    %332 = memref.load %arg4[%331, %c1_143] : memref<2x8xf32, #tpu.memory_space<smem>>
    %333 = vector.broadcast %332 : f32 to vector<1x256xf32>
    %334 = arith.select %330, %333, %328 : vector<1x256xi1>, vector<1x256xf32>
    %c2_i32 = arith.constant 2 : i32
    %335 = vector.broadcast %c2_i32 : i32 to vector<1x256xi32>
    %336 = arith.cmpi eq, %321, %335 : vector<1x256xi32>
    %337 = arith.index_cast %arg0 : i32 to index
    %c2_144 = arith.constant 2 : index
    %338 = memref.load %arg4[%337, %c2_144] : memref<2x8xf32, #tpu.memory_space<smem>>
    %339 = vector.broadcast %338 : f32 to vector<1x256xf32>
    %340 = arith.select %336, %339, %334 : vector<1x256xi1>, vector<1x256xf32>
    %c3_i32 = arith.constant 3 : i32
    %341 = vector.broadcast %c3_i32 : i32 to vector<1x256xi32>
    %342 = arith.cmpi eq, %321, %341 : vector<1x256xi32>
    %343 = arith.index_cast %arg0 : i32 to index
    %c3_145 = arith.constant 3 : index
    %344 = memref.load %arg4[%343, %c3_145] : memref<2x8xf32, #tpu.memory_space<smem>>
    %345 = vector.broadcast %344 : f32 to vector<1x256xf32>
    %346 = arith.select %342, %345, %340 : vector<1x256xi1>, vector<1x256xf32>
    %c4_i32 = arith.constant 4 : i32
    %347 = vector.broadcast %c4_i32 : i32 to vector<1x256xi32>
    %348 = arith.cmpi eq, %321, %347 : vector<1x256xi32>
    %349 = arith.index_cast %arg0 : i32 to index
    %c4_146 = arith.constant 4 : index
    %350 = memref.load %arg4[%349, %c4_146] : memref<2x8xf32, #tpu.memory_space<smem>>
    %351 = vector.broadcast %350 : f32 to vector<1x256xf32>
    %352 = arith.select %348, %351, %346 : vector<1x256xi1>, vector<1x256xf32>
    %c5_i32 = arith.constant 5 : i32
    %353 = vector.broadcast %c5_i32 : i32 to vector<1x256xi32>
    %354 = arith.cmpi eq, %321, %353 : vector<1x256xi32>
    %355 = arith.index_cast %arg0 : i32 to index
    %c5_147 = arith.constant 5 : index
    %356 = memref.load %arg4[%355, %c5_147] : memref<2x8xf32, #tpu.memory_space<smem>>
    %357 = vector.broadcast %356 : f32 to vector<1x256xf32>
    %358 = arith.select %354, %357, %352 : vector<1x256xi1>, vector<1x256xf32>
    %c6_i32 = arith.constant 6 : i32
    %359 = vector.broadcast %c6_i32 : i32 to vector<1x256xi32>
    %360 = arith.cmpi eq, %321, %359 : vector<1x256xi32>
    %361 = arith.index_cast %arg0 : i32 to index
    %c6_148 = arith.constant 6 : index
    %362 = memref.load %arg4[%361, %c6_148] : memref<2x8xf32, #tpu.memory_space<smem>>
    %363 = vector.broadcast %362 : f32 to vector<1x256xf32>
    %364 = arith.select %360, %363, %358 : vector<1x256xi1>, vector<1x256xf32>
    %c7_i32 = arith.constant 7 : i32
    %365 = vector.broadcast %c7_i32 : i32 to vector<1x256xi32>
    %366 = arith.cmpi eq, %321, %365 : vector<1x256xi32>
    %367 = arith.index_cast %arg0 : i32 to index
    %c7_149 = arith.constant 7 : index
    %368 = memref.load %arg4[%367, %c7_149] : memref<2x8xf32, #tpu.memory_space<smem>>
    %369 = vector.broadcast %368 : f32 to vector<1x256xf32>
    %370 = arith.select %366, %369, %364 : vector<1x256xi1>, vector<1x256xf32>
    %c0_150 = arith.constant 0 : index
    %c0_151 = arith.constant 0 : index
    %c0_152 = arith.constant 0 : index
    %371 = vector.load %arg10[%c0_150, %c0_151, %c0_152] : memref<1x1x256xf32, #tpu.memory_space<vmem>>, vector<1x1x256xf32>
    %372 = vector.shape_cast %371 : vector<1x1x256xf32> to vector<1x256xf32>
    %373 = vector.shape_cast %370 : vector<1x256xf32> to vector<1x1x256xf32>
    tpu.vector_store %arg10[%c0_150, %c0_151, %c0_152], %373 {strides = array<i32>} : memref<1x1x256xf32, #tpu.memory_space<vmem>>, vector<1x1x256xf32>,
    return
  }
  func.func @transform_0(%arg0: i32, %arg1: i32) -> (i32, i32, i32, i32) {
    %c0_i32 = arith.constant 0 : i32
    %c0_i32_0 = arith.constant 0 : i32
    %c0_i32_1 = arith.constant 0 : i32
    return %arg0, %c0_i32, %c0_i32_0, %arg1 : i32, i32, i32, i32
  }
  func.func @transform_1(%arg0: i32, %arg1: i32) -> (i32, i32, i32, i32) {
    %c0_i32 = arith.constant 0 : i32
    %c0_i32_0 = arith.constant 0 : i32
    %c0_i32_1 = arith.constant 0 : i32
    return %arg0, %c0_i32, %c0_i32_0, %arg1 : i32, i32, i32, i32
  }
  func.func @transform_2(%arg0: i32, %arg1: i32) -> (i32, i32) {
    %c0_i32 = arith.constant 0 : i32
    %c0_i32_0 = arith.constant 0 : i32
    %c0_i32_1 = arith.constant 0 : i32
    return %c0_i32, %c0_i32_0 : i32, i32
  }
  func.func @transform_3(%arg0: i32, %arg1: i32) -> i32 {
    %c0_i32 = arith.constant 0 : i32
    %c0_i32_0 = arith.constant 0 : i32
    return %c0_i32 : i32
  }
  func.func @transform_4(%arg0: i32, %arg1: i32) -> (i32, i32, i32) {
    %c0_i32 = arith.constant 0 : i32
    %c0_i32_0 = arith.constant 0 : i32
    return %arg0, %c0_i32, %arg1 : i32, i32, i32
  }
  func.func @transform_5(%arg0: i32, %arg1: i32) -> (i32, i32, i32) {
    %c0_i32 = arith.constant 0 : i32
    %c0_i32_0 = arith.constant 0 : i32
    return %arg0, %c0_i32, %arg1 : i32, i32, i32
  }
  func.func @transform_6(%arg0: i32, %arg1: i32) -> (i32, i32, i32) {
    %c0_i32 = arith.constant 0 : i32
    %c0_i32_0 = arith.constant 0 : i32
    return %arg0, %c0_i32, %arg1 : i32, i32, i32
  }
  func.func @transform_7(%arg0: i32, %arg1: i32) -> (i32, i32, i32) {
    %c0_i32 = arith.constant 0 : i32
    %c0_i32_0 = arith.constant 0 : i32
    return %arg0, %c0_i32, %arg1 : i32, i32, i32
  }
  func.func @transform_8(%arg0: i32, %arg1: i32) -> (i32, i32, i32) {
    %c0_i32 = arith.constant 0 : i32
    %c0_i32_0 = arith.constant 0 : i32
    return %arg0, %c0_i32, %arg1 : i32, i32, i32
  }
}

</mosaic_0001>

<bundles_post_ra>
// kernel: custom-call.31
= control target key start
LH: loop header
LB: loop body
LE: loop exit
PB: predicated region body
PF: predicated region fallthrough
CT: control target
= control target key end

     0   :  { %5 = vsyncpa [#allocation6], 0  ;;  %s896_s0 = inlined_call_operand.vmem [shape: f32[2,4,4], index: 0, kind: input, shape index: {}]   ;;  %s897_s1 = inlined_call_operand.vmem [shape: f32[2,4,4], index: 1, kind: output, shape index: {0}]   ;;  %s898_s2 = inlined_call_operand.hbm [shape: s32[2,4], index: 2, kind: output, shape index: {1}]   ;;  %s899_s3 = inlined_call_operand.vmem [shape: s32[2,4], index: 3, kind: output, shape index: {2}]  }
   0x1   :  { %7 = vsyncpa [#allocation6 + $0x1], 0  ;;  %s715_s12 = smov 0   ;;  %s717_s13 = smov 0  }
   0x2   :  { %s719_s14 = smov 0   ;;  %s721_s15 = smov 0  }
   0x3 LB: > { %s736_s16 = sadd.s32 4294967295, %s687_s15   ;;  %s550_s17 = sadd.s32 4294967294, %s687_s15   ;;  %s687_s15 = sphi %s721_s15, %s907_s15   ;;  %s683_s14 = sphi %s719_s14, %s906_s14   ;;  %s679_s13 = sphi %s717_s13, %s905_s13   ;;  %s675_s12 = sphi %s715_s12, %s904_s12  }
   0x4   : > { %s740_s18 = sadd.s32 1, %s687_s15   ;;  %s17_s19 = sshrl.u32 %s687_s15, 3 }
   0x5   : > { %s18_s20 = sshrl.u32 %s740_s18, 3  ;;  %s22_s21 = sadd.s32 1, %s683_s14 }
   0x6   : > { %s19_s22 = ssub.s32 %s17_s19, %s18_s20  ;;  %p32_p0 = scmp.ne.s32.totalorder %s683_s14, %s679_s13 }
   0x7   : > { %p20_p1 = scmp.eq.s32.totalorder %s19_s22, 0  ;;  %p33_p2 = scmp.eq.s32.totalorder %s736_s16, 1 }
   0x8   : > { %p38_p3 = scmp.ne.s32.totalorder %s679_s13, %s675_s12  ;;  %p39_p4 = scmp.eq.s32.totalorder %s550_s17, 1 }
   0x9   : > { %s751_s23 = scalar_select %p20_p1, %s683_s14, %s22_s21  }
   0xa   : > { %p753_p5 = por %p33_p2, %p32_p0  ;;  %p757_p6 = por %p39_p4, %p38_p3 }
   0xb   : > { %p552_p7 = scmp.ge.s32.totalorder %s687_s15, 2 }
   0xc   : > { %s85_s26 = sand.u32 (!%p552_p7), 1, %s687_s15   ;;  %s554_s27 = sshll.u32 (!%p552_p7), %s687_s15, 2 }
   0xd   : > { %83 = sbr.rel (%p552_p7) target bundleno = 20 (0x14), region = 16  ;;  %s553_s28 = sshll.u32 (!%p552_p7), %s85_s26, 2 }
   0xe   : > { %s89_s4 = scalar_lea.vmem (!%p552_p7), %s896_s0, %s554_s27  ;;  %s87_s5 = scalar_lea.vmem (!%p552_p7), [#allocation1], %s553_s28 }
   0xf   : > { %v105_v0 = vld [vmem:[%s89_s4] sm:$0xf] (!%p552_p7) }
  0x10   : > { %106 = vst [vmem:[%s87_s5] sm:$0xf] (!%p552_p7), %v105_v0 }
  0x14 PF: > { %p555_p8 = scmp.ge.s32.totalorder %s687_s15, 1  ;;  %p122_p9 = scmp.lt.s32.totalorder %s687_s15, 3 }
  0x16   : > { %p123_p10 = pnand %p555_p8, %p122_p9 }
  0x18   : > { %126 = sbr.rel (%p123_p10) target bundleno = 451 (0x1c3), region = 50 }
  0x1f   : > { %s133_s6 = sand.u32 1, %s736_s16   ;;  %s144_s7 = sand.u32 1, %s679_s13   ;;  %v166_v1 = vlaneseq  ;;  %v693_v4 = vmov 0  }
  0x20   : > { %s773_s8 = sshll.u32 %s133_s6, 2  ;;  %s777_s9 = sshll.u32 %s144_s7, 1 }
  0x21   : > { %v780_v2 = vshrl.u32 %v166_v1, 7  ;;  %s135_s10 = scalar_lea.vmem [#allocation1], %s773_s8  ;;  %s161_s11 = sand.u32 7, %s736_s16  }
  0x22   : > { %v155_v3 = vld [vmem:[%s135_s10] sm:$0xf]  ;;  %s785_s17 = scalar_lea.vmem [#allocation4], %s161_s11  ;;  %s139_s19 = scalar_lea.vmem [#allocation3], %s773_s8 }
  0x23   : > { %156 = vst [vmem:[#allocation0] sm:$0xf] %v155_v3  ;;  %170 = vst [vmem:[#allocation9] sm:$0xff] %v780_v2  ;;  %s146_s20 = scalar_lea.vmem [#allocation5], %s777_s9  ;;  %s152_s21 = scalar_lea.vmem [#allocation8], %s777_s9 }
  0x24   : > { %165 = vst [vmem:[%s785_s17] sm:$0x1] %v693_v4  ;;  %s791_s22 = scalar_lea.vmem [#allocation7], %s161_s11  ;;  %s793_s26 = smov 0  }
  0x2a   : > { %v159_v5 = vld [vmem:[#allocation0] sm:$0xff] }
  0x2b   : > { %160 = vst [vmem:[#allocation2] sm:$0xff] %v159_v5 }
  0x2c LB: >> { %vm186_vm0 = vcmp.lt.s32.totalorder %v780_v2, 4  ;;  %v800_v8 = vstv %s691_s26  ;;  %s227_s27 = ssub.s32 128, %s691_s26  ;;  %v233_v38 = vand.u32 127, %v166_v1  ;;  %v236_v40 = vld [vmem:[%s785_s17] ss:$0 sm:$0xff]  ;;  %s239_s28 = scalar_lea.vmem [#allocation2], %s691_s26  ;;  %s691_s26 = sphi %s793_s26, %s176_s26  }
  0x2d   : >> { %vm185_vm1 = vcmp.ge.s32.totalorder %v780_v2, %v800_v8  ;;  %s245_s30 = scalar_lea.vmem [#allocation9], %s691_s26  ;;  %vm265_vm15 = vcmp.gt.s32.totalorder %v780_v2, %v800_v8  ;;  %s176_s26 = sadd.s32 1, %s691_s26  }
  0x2e   : >> { %vm187_vm3 = vmand %vm185_vm1, %vm186_vm0  ;;  %vm257_vm12 = vcmp.gt.s32.totalorder %v233_v38, %v800_v8  ;;  %vm234_vm13 = vcmp.eq.s32.totalorder %v233_v38, %v800_v8  ;;  %v247_v42 = vld [vmem:[%s245_s30] ss:$0 sm:$0xff]  ;;  %p173_p11 = scmp.ge.s32.totalorder %s176_s26, 4  }
  0x2f   : >> { %vm269_vm1 = vmand %vm265_vm15, %vm234_vm13  ;;  %s900_s6 = sshrl.u32 (%p173_p11), %s736_s16, 3  ;;  %s564_s10 = sshll.u32 (%p173_p11), %s736_s16, 2 }
  0x30   : > { %s565_s11 = sshll.u32 (%p173_p11), %s900_s6, 5 }
  0x32   : >> { %v181_v6 = vld [vmem:[#allocation2] sm:$0xff]  ;;  %v241_v41 = vld [vmem:[%s239_s28] ss:$0 sm:$0xff] }
  0x33   : >> { %v182_v7 = vand.u32 2147483647, %v181_v6 }
  0x35   : >> { %vm560_vm2 = vcmp.gt.f32.partialorder %v182_v7, -inf }
  0x36   : >> { %vm189_vm4 = vmand %vm187_vm3, %vm560_vm2 }
  0x37   : >> { %v190_v9 = vsel %vm189_vm4, %v780_v2, %v800_v8  ;;  %v191_v10 = vsel %vm189_vm4, %v182_v7, -inf }
  0x38   : >> { %v192_v11 = vrot.slane %v191_v10, 1  ;;  %v193_v12 = vrot.slane %v190_v9, 1 }
  0x3a   : >> { %vm194_vm5 = vcmp.ge.f32.partialorder %v192_v11, %v191_v10  ;;  %v197_v13 = vrot.slane %v192_v11, 1  ;;  %v198_v14 = vrot.slane %v193_v12, 1 }
  0x3b   : >> { %v195_v15 = vsel %vm194_vm5, %v192_v11, %v191_v10  ;;  %v196_v16 = vsel %vm194_vm5, %v193_v12, %v190_v9 }
  0x3c   : >> { %vm199_vm6 = vcmp.ge.f32.partialorder %v197_v13, %v195_v15  ;;  %v202_v17 = vrot.slane %v197_v13, 1  ;;  %v203_v18 = vrot.slane %v198_v14, 1 }
  0x3d   : >> { %v200_v19 = vsel %vm199_vm6, %v197_v13, %v195_v15  ;;  %v201_v20 = vsel %vm199_vm6, %v198_v14, %v196_v16 }
  0x3e   : >> { %vm204_vm7 = vcmp.ge.f32.partialorder %v202_v17, %v200_v19  ;;  %v207_v21 = vrot.slane %v202_v17, 1  ;;  %v208_v22 = vrot.slane %v203_v18, 1 }
  0x3f   : >> { %v205_v23 = vsel %vm204_vm7, %v202_v17, %v200_v19  ;;  %v206_v24 = vsel %vm204_vm7, %v203_v18, %v201_v20 }
  0x40   : >> { %vm209_vm8 = vcmp.ge.f32.partialorder %v207_v21, %v205_v23  ;;  %v212_v25 = vrot.slane %v207_v21, 1  ;;  %v213_v26 = vrot.slane %v208_v22, 1 }
  0x41   : >> { %v210_v27 = vsel %vm209_vm8, %v207_v21, %v205_v23  ;;  %v211_v28 = vsel %vm209_vm8, %v208_v22, %v206_v24 }
  0x42   : >> { %vm214_vm9 = vcmp.ge.f32.partialorder %v212_v25, %v210_v27  ;;  %v217_v29 = vrot.slane %v212_v25, 1  ;;  %v218_v30 = vrot.slane %v213_v26, 1 }
  0x43   : >> { %v215_v31 = vsel %vm214_vm9, %v212_v25, %v210_v27  ;;  %v216_v32 = vsel %vm214_vm9, %v213_v26, %v211_v28 }
  0x44   : >> { %vm219_vm10 = vcmp.ge.f32.partialorder %v217_v29, %v215_v31  ;;  %v222_v33 = vrot.slane %v217_v29, 1  ;;  %v223_v34 = vrot.slane %v218_v30, 1 }
  0x45   : >> { %v220_v35 = vsel %vm219_vm10, %v217_v29, %v215_v31  ;;  %v221_v36 = vsel %vm219_vm10, %v218_v30, %v216_v32 }
  0x46   : >> { %vm224_vm11 = vcmp.ge.f32.partialorder %v222_v33, %v220_v35 }
  0x47   : >> { %v226_v37 = vsel %vm224_vm11, %v223_v34, %v221_v36 }
  0x48   : >> { %228 = vrot.lane.b32.xlu0 %v226_v37, %s227_s27  ;;  %s357_s27 = scalar_lea.vmem (%p173_p11), %s897_s1, %s564_s10 }
  0xba   : >> { %v229_v39 = vpop.permute.xlu0 %228 }
  0xbb   : >> { %569 = vpush %v229_v39 }
  0xec   : >> { %s570_s29 = spop %569 }
  0xed   : >> { %v235_v43 = vstv %s570_s29  ;;  %s240_s4 = scalar_lea.vmem [#allocation2], %s570_s29  ;;  %s246_s5 = scalar_lea.vmem [#allocation9], %s570_s29 }
  0xee   : >> { %v242_v44 = vld [vmem:[%s240_s4] ss:$0 sm:$0xff]  ;;  %v237_v46 = vsel %vm234_vm13, %v235_v43, %v236_v40 }
  0xef   : >> { %v248_v45 = vld [vmem:[%s246_s5] ss:$0 sm:$0xff]  ;;  %243 = vst [vmem:[%s240_s4] sm:$0x1] %v241_v41  ;;  %vm251_vm14 = vcmp.ne.f32.partialorder %v242_v44, 0.0  ;;  %238 = vst [vmem:[%s785_s17] sm:$0x1] %v237_v46  ;;  %v258_v53 = vsel %vm257_vm12, %v242_v44, 0.0 }
  0xf0   : >> { %249 = vst [vmem:[%s246_s5] sm:$0x1] %v247_v42  ;;  %244 = vst [vmem:[%s239_s28] sm:$0x1] %v242_v44  ;;  %s399_s4 = sshll.u32 (%p173_p11), %s146_s20, 4  ;;  %s348_s5 = scalar_lea.sflag (%p173_p11), [#allocation6], %s144_s7  ;;  %s400_s4 = int_to_ptr.vmem [resolvable:$true] %s399_s4 }
  0xf1   : >> { %250 = vst [vmem:[%s245_s30] sm:$0x1] %v248_v45  ;;  %vm252_vm0 = vmand %vm234_vm13, %vm251_vm14  ;;  %s843_s30 = scalar_lea.hbm (%p173_p11), %s898_s2, %s565_s11  ;;  %s621_s6 = scalar_lea.vmem (%p173_p11), %s400_s4, 32 }
  0xf2   : >> { %v253_v47 = vsel %vm252_vm0, %v242_v44, 1.0  ;;  %p622_p12 = scmp.ne.s32.totalorder (%p173_p11), %s400_s4, %s621_s6  ;;  %s694_s17 = smov (%p173_p11), [#allocation5]  }
  0xf3   : >> { %v266_v48 = vsel %vm265_vm15, %v253_v47, 1.0  ;;  %s625_s10 = sshll.u32 (%p173_p11), %s694_s17, 4  ;;  %s626_s10 = int_to_ptr.vmem [resolvable:$false] %s625_s10 }
  0xf4   : >> { %619 = vrcp.f32 %v266_v48  ;;  %p623_p13 = pnand (%p173_p11), %p622_p12, %p753_p5  ;;  %s627_s8 = scalar_lea.vmem (%p173_p11), %s626_s10, 64 }
  0xf5   : > { %p628_p1 = scmp.lt.s32.totalorder (%p173_p11), %s400_s4, %s626_s10  ;;  %p629_p2 = scmp.lt.s32.totalorder (%p173_p11), %s627_s8, %s621_s6 }
  0xf6   : > { %v334_v59 = vld [vmem:[#allocation4] sm:$0x3] (%p173_p11)  ;;  %p624_p0 = pneg (%p173_p11), %p623_p13 }
  0xf7   : >> { %v262_v50 = vld [vmem:[#allocation2] sm:$0xff]  ;;  %336 = vst [vmem:[%s146_s20] sm:$0x3] (%p173_p11), %v334_v59  ;;  %p630_p3 = por (%p173_p11), %p629_p2, %p628_p1 }
  0xf8   : > { %v276_v57 = vld [vmem:[#allocation9] sm:$0xff] (%p173_p11) }
  0xf9   : > { %p631_p4 = pnand (%p173_p11), %p630_p3, %p624_p0 }
  0xfe   : >> { %v620_v49 = vpop.eup %619 }
  0xff   : >> { %v268_v51 = vmul.f32 %v620_v49, %v262_v50 }
 0x101   : >> { %v270_v52 = vsel %vm269_vm1, %v268_v51, 0.0 }
 0x102   : >> { %271 = vadd.xlane.f32.xlu0 %v270_v52 }
 0x12f   : > { %292 = vxpose.xlu0.b32.start.end [1/1] (short) (narrow) (%p173_p11), %v276_v57, 8 }
 0x18e   : > { %175 = sbr.rel (!%p173_p11) target bundleno = 44 (0x2c), region = 202 }
 0x18f   : >> { %v272_v54 = vpop.xlane.xlu0 %271 }
 0x190   : >> { %v273_v55 = vmul.f32 %v272_v54, %v258_v53 }
 0x192   : >> { %v274_v56 = vsub.f32 %v268_v51, %v273_v55 }
 0x194   : >> { %275 = vst [vmem:[#allocation2] sm:$0xff] %v274_v56 }
 0x19b   : > { %v328_v58 = vld [vmem:[#allocation2] sm:$0xf] }
 0x19c   : > { %330 = vst [vmem:[%s139_s19] sm:$0xf] %v328_v58 }
 0x1a3   : > { %v373_v60 = vld [vmem:[%s139_s19] sm:$0xf] }
 0x1a4   : > { %374 = vst [vmem:[%s357_s27] sm:$0xf] %v373_v60 }
 0x1a5   : > { %634 = shalt.err (!%p631_p4)
}
 0x1a6   : > { %s635_s7 = scalar_lea.hbm %s843_s30, 32  ;;  %s639_s11 = scalar_lea.hbm %s898_s2, 32 }
 0x1a7   : > { %p636_p8 = scmp.ne.s32.totalorder %s843_s30, %s635_s7  ;;  %p640_p11 = scmp.lt.u32.totalorder %s843_s30, %s898_s2 }
 0x1a8   : > { %p641_p12 = scmp.lt.u32.totalorder %s639_s11, %s635_s7  ;;  %p643_p0 = scmp.lt.u32.totalorder %s635_s7, %s843_s30 }
 0x1a9   : > { %p637_p9 = pnand %p636_p8, %p753_p5 }
 0x1aa   : > { %p642_p13 = por %p641_p12, %p640_p11 }
 0x1ab   : > { %p638_p10 = pneg %p637_p9 }
 0x1ac   : > { %p644_p1 = por %p643_p0, %p642_p13 }
 0x1ae   : > { %p645_p2 = pnand %p644_p1, %p638_p10 }
 0x1b0   : > { %648 = shalt.err (!%p645_p2)
}
 0x1b1   : > { %571 = dma.vmem_to_hbm [thread:$0]  (%p753_p5), %s400_s4, 32, %s843_s30, %s348_s5   ;;  %v308_v61 = vpop.trf.xlu0 }
 0x1b2   : > { %324 = vst [vmem:[%s791_s22] sm:$0x1] %v308_v61  ;;  %s903_s6 = sshrl.u32 (%p753_p5), %s736_s16, 3 }
 0x1b3   : > { %s566_s28 = sshll.u32 (%p753_p5), %s903_s6, 1 }
 0x1b4   : > { %405 = sbr.rel (!%p753_p5) target bundleno = 451 (0x1c3), region = 96  ;;  %s408_s10 = scalar_lea.vmem (%p753_p5), %s899_s3, %s566_s28 }
 0x1b9   : > { %v340_v62 = vld [vmem:[#allocation7] sm:$0x3] }
 0x1ba   : > { %342 = vst [vmem:[%s152_s21] sm:$0x3] %v340_v62 }
 0x1c1   : > { %v424_v63 = vld [vmem:[%s152_s21] sm:$0x3] }
 0x1c2   : > { %425 = vst [vmem:[%s408_s10] sm:$0x3] %v424_v63 }
 0x1c3 PF: > { %s452_s22 = sand.u32 1, %s675_s12   ;;  %p574_p5 = pnand %p552_p7, %p757_p6 }
 0x1c4   : > { %s453_s24 = scalar_lea.sflag [#allocation6], %s452_s22 }
 0x1c5   : > { %670 = dma.done.wait (!%p574_p5), %s453_s24, 32  }
 0x1c6   : > { %672 = vsyncadd (!%p574_p5), %s453_s24, 4294967264  ;;  %p10_p3 = scmp.ge.s32.totalorder %s740_s18, 4   ;;  %s904_s12 = smov %s679_s13 }
 0x1c7   : > { %s905_s13 = smov %s683_s14  ;;  %s906_s14 = smov %s751_s23 }
 0x1c8   : > { %s907_s15 = smov %s740_s18  ;;  %12 = sbr.rel (!%p10_p3) target bundleno = 3 (0x3), region = 213 }
 0x1cf   :  { %465 = vsyncpa [#allocation6], 1 }
 0x1d0   :  { %467 = vsyncpa [#allocation6 + $0x1], 1 }

// kernel: custom-call.33
= control target key start
LH: loop header
LB: loop body
LE: loop exit
PB: predicated region body
PF: predicated region fallthrough
CT: control target
= control target key end

     0   :  { %s353_s6 = smov 0   ;;  %s355_s7 = smov 0   ;;  %s400_s0 = inlined_call_operand.vmem [shape: f32[2,1,4,4], index: 0, kind: input, shape index: {}]   ;;  %s401_s1 = inlined_call_operand.vmem [shape: f32[2,1,4,4], index: 1, kind: output, shape index: {}]  }
   0x1   :  { %s357_s8 = smov 0  }
   0x2 LB: > { %s279_s9 = sadd.s32 4294967295, %s340_s8   ;;  %s33_s10 = sadd.s32 1, %s336_s7  ;;  %s340_s8 = sphi %s357_s8, %s7_s8   ;;  %s336_s7 = sphi %s355_s7, %s403_s7   ;;  %s332_s6 = sphi %s353_s6, %s402_s6  }
   0x3   : > { %p35_p0 = scmp.ge.s32.totalorder %s33_s10, 2  ;;  %p281_p1 = scmp.ge.s32.totalorder %s340_s8, 2 }
   0x4   : > { %s49_s11 = sand.u32 (!%p281_p1), 1, %s340_s8   ;;  %s283_s12 = sshll.u32 (!%p281_p1), %s336_s7, 2 }
   0x5   : > { %s405_s10 = smov (%p35_p0, %s33_s10), 0  ;;  %47 = sbr.rel (%p281_p1) target bundleno = 12 (0xc), region = 16 }
   0x6   : > { %s282_s13 = sshll.u32 (!%p281_p1), %s49_s11, 2  ;;  %s56_s16 = scalar_lea.vmem (!%p281_p1), %s400_s0, %s283_s12 }
   0x7   : > { %v72_v0 = vld [vmem:[%s56_s16] sm:$0xf] (!%p281_p1)  ;;  %s51_s17 = scalar_lea.vmem (!%p281_p1), [#allocation1], %s282_s13 }
   0x8   : > { %73 = vst [vmem:[%s51_s17] sm:$0xf] (!%p281_p1), %v72_v0 }
   0xc PF: > { %p284_p2 = scmp.ge.s32.totalorder %s340_s8, 1  ;;  %p89_p3 = scmp.lt.s32.totalorder %s340_s8, 3 }
   0xe   : > { %p90_p4 = pnand %p284_p2, %p89_p3 }
  0x10   : > { %93 = sbr.rel (%p90_p4) target bundleno = 656 (0x290), region = 50 }
  0x17   : > { %s380_s18 = sand.u32 1, %s279_s9   ;;  %v111_v1 = vlaneseq  ;;  %v342_v11 = vmov -1.0   ;;  %s288_s22 = sshll.u32 %s332_s6, 2 }
  0x18   : > { %s285_s19 = sshll.u32 %s380_s18, 2  ;;  %s188_s25 = scalar_lea.vmem %s401_s1, %s288_s22 }
  0x19   : > { %s102_s20 = scalar_lea.vmem [#allocation1], %s285_s19  ;;  %v112_v3 = vand.u32 127, %v111_v1  ;;  %v115_v4 = vshrl.u32 %v111_v1, 7  ;;  %s106_s21 = scalar_lea.vmem [#allocation3], %s285_s19 }
  0x1a   : > { %v109_v2 = vld [vmem:[%s102_s20] sm:$0xf] }
  0x1b   : > { %110 = vst [vmem:[#allocation0] sm:$0xf] %v109_v2  ;;  %vm113_vm0 = vcmp.lt.s32.totalorder %v112_v3, 4  ;;  %vm122_vm1 = vcmp.ge.s32.totalorder %v115_v4, %v112_v3  ;;  %vm117_vm2 = vcmp.eq.s32.totalorder %v115_v4, %v112_v3  ;;  %vm136_vm4 = vcmp.eq.s32.totalorder %v112_v3, 0 }
  0x1c   : > { %vm123_vm3 = vmand %vm122_vm1, %vm113_vm0  ;;  %vm133_vm5 = vcmp.eq.s32.totalorder %v112_v3, %v115_v4  ;;  %v137_v12 = vsel %vm136_vm4, 1.0, %v342_v11  ;;  %vm144_vm6 = vcmp.eq.s32.totalorder %v112_v3, 1  ;;  %vm154_vm7 = vcmp.eq.s32.totalorder %v112_v3, 2 }
  0x1d   : > { %v138_v13 = vsel %vm133_vm5, %v137_v12, 0.0  ;;  %vm164_vm8 = vcmp.eq.s32.totalorder %v112_v3, 3 }
  0x22   : > { %v118_v5 = vld [vmem:[#allocation0] sm:$0xff] }
  0x23   : > { %v119_v6 = vsel %vm117_vm2, %v118_v5, 0.0  ;;  %v124_v7 = vsel %vm123_vm3, %v118_v5, 0.0 }
  0x24   : > { %120 = vadd.xlane.f32.xlu0 %v119_v6 }
  0xb1   : > { %v121_v8 = vpop.xlane.xlu0 %120 }
  0xb2   : > { %316 = vrcp.f32 %v121_v8  ;;  %vm171_vm9 = vweird.f32 %v121_v8 }
  0xbc   : > { %v317_v9 = vpop.eup %316 }
  0xbd   : > { %v126_v10 = vmul.f32 %v317_v9, %v124_v7 }
  0xbf   : > { %127 = vst [vmem:[#allocation4] sm:$0xff] %v126_v10 }
  0xc6   : > { %v140_v14 = vld [vmem:[#allocation4 + $0x1] ss:$0 sm:$0xff]  ;;  %v150_v17 = vld [vmem:[#allocation4 + $0x2] ss:$0 sm:$0xff]  ;;  %v160_v22 = vld [vmem:[#allocation4 + $0x3] ss:$0 sm:$0xff] }
  0xc7   : > { %v141_v15 = vxor.u32 2147483648, %v140_v14  ;;  %v151_v19 = vxor.u32 2147483648, %v150_v17  ;;  %v161_v24 = vxor.u32 2147483648, %v160_v22 }
  0xc9   : > { %v145_v16 = vmul.f32 %v141_v15, %v138_v13 }
  0xcb   : > { %146 = vadd.xlane.f32.xlu0 %v145_v16 }
 0x158   : > { %v147_v18 = vpop.xlane.xlu0 %146 }
 0x159   : > { %v148_v20 = vsel %vm144_vm6, %v147_v18, %v138_v13 }
 0x15a   : > { %v155_v21 = vmul.f32 %v151_v19, %v148_v20 }
 0x15c   : > { %156 = vadd.xlane.f32.xlu1 %v155_v21 }
 0x1e9   : > { %v157_v23 = vpop.xlane.xlu1 %156 }
 0x1ea   : > { %v158_v25 = vsel %vm154_vm7, %v157_v23, %v148_v20 }
 0x1eb   : > { %v165_v26 = vmul.f32 %v161_v24, %v158_v25 }
 0x1ed   : > { %166 = vadd.xlane.f32.xlu1 %v165_v26 }
 0x27a   : > { %v167_v27 = vpop.xlane.xlu1 %166 }
 0x27b   : > { %v168_v28 = vsel %vm164_vm8, %v167_v27, %v158_v25 }
 0x27c   : > { %v170_v29 = vmul.f32 %v317_v9, %v168_v28 }
 0x27e   : > { %v172_v30 = vsel %vm171_vm9, %v168_v28, %v170_v29 }
 0x27f   : > { %173 = vst [vmem:[#allocation2] sm:$0xff] %v172_v30 }
 0x286   : > { %v177_v31 = vld [vmem:[#allocation2] sm:$0xf] }
 0x287   : > { %179 = vst [vmem:[%s106_s21] sm:$0xf] %v177_v31 }
 0x28e   : > { %v204_v32 = vld [vmem:[%s106_s21] sm:$0xf] }
 0x28f   : > { %205 = vst [vmem:[%s188_s25] sm:$0xf] %v204_v32 }
 0x290 PF: > { %s7_s8 = sadd.s32 1, %s340_s8   ;;  %s402_s6 = smov %s336_s7 }
 0x291   : > { %p4_p5 = scmp.ge.s32.totalorder %s7_s8, 4   ;;  %s403_s7 = smov %s405_s10 }
 0x293   :  { %6 = sbr.rel (!%p4_p5) target bundleno = 2 (0x2), region = 113 }

// kernel: custom-call.32
= control target key start
LH: loop header
LB: loop body
LE: loop exit
PB: predicated region body
PF: predicated region fallthrough
CT: control target
= control target key end

     0   :  { %s352_s6 = smov 0   ;;  %s354_s7 = smov 0   ;;  %s399_s0 = inlined_call_operand.vmem [shape: f32[2,1,4,4], index: 0, kind: input, shape index: {}]   ;;  %s400_s1 = inlined_call_operand.vmem [shape: f32[2,1,4,4], index: 1, kind: output, shape index: {}]  }
   0x1   :  { %s356_s8 = smov 0  }
   0x2 LB: > { %s278_s9 = sadd.s32 4294967295, %s339_s8   ;;  %s33_s10 = sadd.s32 1, %s335_s7  ;;  %s339_s8 = sphi %s356_s8, %s7_s8   ;;  %s335_s7 = sphi %s354_s7, %s402_s7   ;;  %s331_s6 = sphi %s352_s6, %s401_s6  }
   0x3   : > { %p35_p0 = scmp.ge.s32.totalorder %s33_s10, 2  ;;  %p280_p1 = scmp.ge.s32.totalorder %s339_s8, 2 }
   0x4   : > { %s49_s11 = sand.u32 (!%p280_p1), 1, %s339_s8   ;;  %s282_s12 = sshll.u32 (!%p280_p1), %s335_s7, 2 }
   0x5   : > { %s404_s10 = smov (%p35_p0, %s33_s10), 0  ;;  %47 = sbr.rel (%p280_p1) target bundleno = 12 (0xc), region = 16 }
   0x6   : > { %s281_s13 = sshll.u32 (!%p280_p1), %s49_s11, 2  ;;  %s56_s16 = scalar_lea.vmem (!%p280_p1), %s399_s0, %s282_s12 }
   0x7   : > { %v72_v0 = vld [vmem:[%s56_s16] sm:$0xf] (!%p280_p1)  ;;  %s51_s17 = scalar_lea.vmem (!%p280_p1), [#allocation1], %s281_s13 }
   0x8   : > { %73 = vst [vmem:[%s51_s17] sm:$0xf] (!%p280_p1), %v72_v0 }
   0xc PF: > { %p283_p2 = scmp.ge.s32.totalorder %s339_s8, 1  ;;  %p89_p3 = scmp.lt.s32.totalorder %s339_s8, 3 }
   0xe   : > { %p90_p4 = pnand %p283_p2, %p89_p3 }
  0x10   : > { %93 = sbr.rel (%p90_p4) target bundleno = 656 (0x290), region = 50 }
  0x17   : > { %s379_s18 = sand.u32 1, %s278_s9   ;;  %v111_v1 = vlaneseq  ;;  %v341_v11 = vmov -1.0   ;;  %s287_s22 = sshll.u32 %s331_s6, 2 }
  0x18   : > { %s284_s19 = sshll.u32 %s379_s18, 2  ;;  %s187_s25 = scalar_lea.vmem %s400_s1, %s287_s22 }
  0x19   : > { %s102_s20 = scalar_lea.vmem [#allocation1], %s284_s19  ;;  %v112_v3 = vand.u32 127, %v111_v1  ;;  %v115_v4 = vshrl.u32 %v111_v1, 7  ;;  %s106_s21 = scalar_lea.vmem [#allocation3], %s284_s19 }
  0x1a   : > { %v109_v2 = vld [vmem:[%s102_s20] sm:$0xf] }
  0x1b   : > { %110 = vst [vmem:[#allocation0] sm:$0xf] %v109_v2  ;;  %vm113_vm0 = vcmp.lt.s32.totalorder %v112_v3, 4  ;;  %vm122_vm1 = vcmp.le.s32.totalorder %v115_v4, %v112_v3  ;;  %vm117_vm2 = vcmp.eq.s32.totalorder %v115_v4, %v112_v3  ;;  %vm136_vm4 = vcmp.eq.s32.totalorder %v112_v3, 3 }
  0x1c   : > { %vm123_vm3 = vmand %vm122_vm1, %vm113_vm0  ;;  %vm133_vm5 = vcmp.eq.s32.totalorder %v112_v3, %v115_v4  ;;  %v137_v12 = vsel %vm136_vm4, 1.0, %v341_v11  ;;  %vm144_vm6 = vcmp.eq.s32.totalorder %v112_v3, 2  ;;  %vm154_vm7 = vcmp.eq.s32.totalorder %v112_v3, 1 }
  0x1d   : > { %v138_v13 = vsel %vm133_vm5, %v137_v12, 0.0  ;;  %vm163_vm8 = vcmp.eq.s32.totalorder %v112_v3, 0 }
  0x22   : > { %v118_v5 = vld [vmem:[#allocation0] sm:$0xff] }
  0x23   : > { %v119_v6 = vsel %vm117_vm2, %v118_v5, 0.0  ;;  %v124_v7 = vsel %vm123_vm3, %v118_v5, 0.0 }
  0x24   : > { %120 = vadd.xlane.f32.xlu0 %v119_v6 }
  0xb1   : > { %v121_v8 = vpop.xlane.xlu0 %120 }
  0xb2   : > { %315 = vrcp.f32 %v121_v8  ;;  %vm170_vm9 = vweird.f32 %v121_v8 }
  0xbc   : > { %v316_v9 = vpop.eup %315 }
  0xbd   : > { %v126_v10 = vmul.f32 %v316_v9, %v124_v7 }
  0xbf   : > { %127 = vst [vmem:[#allocation4] sm:$0xff] %v126_v10 }
  0xc6   : > { %v140_v14 = vld [vmem:[#allocation4 + $0x2] ss:$0 sm:$0xff]  ;;  %v150_v17 = vld [vmem:[#allocation4 + $0x1] ss:$0 sm:$0xff]  ;;  %v159_v22 = vld [vmem:[#allocation4] ss:$0 sm:$0xff] }
  0xc7   : > { %v141_v15 = vxor.u32 2147483648, %v140_v14  ;;  %v151_v19 = vxor.u32 2147483648, %v150_v17  ;;  %v160_v24 = vxor.u32 2147483648, %v159_v22 }
  0xc9   : > { %v145_v16 = vmul.f32 %v141_v15, %v138_v13 }
  0xcb   : > { %146 = vadd.xlane.f32.xlu0 %v145_v16 }
 0x158   : > { %v147_v18 = vpop.xlane.xlu0 %146 }
 0x159   : > { %v148_v20 = vsel %vm144_vm6, %v147_v18, %v138_v13 }
 0x15a   : > { %v155_v21 = vmul.f32 %v151_v19, %v148_v20 }
 0x15c   : > { %156 = vadd.xlane.f32.xlu1 %v155_v21 }
 0x1e9   : > { %v157_v23 = vpop.xlane.xlu1 %156 }
 0x1ea   : > { %v158_v25 = vsel %vm154_vm7, %v157_v23, %v148_v20 }
 0x1eb   : > { %v164_v26 = vmul.f32 %v160_v24, %v158_v25 }
 0x1ed   : > { %165 = vadd.xlane.f32.xlu1 %v164_v26 }
 0x27a   : > { %v166_v27 = vpop.xlane.xlu1 %165 }
 0x27b   : > { %v167_v28 = vsel %vm163_vm8, %v166_v27, %v158_v25 }
 0x27c   : > { %v169_v29 = vmul.f32 %v316_v9, %v167_v28 }
 0x27e   : > { %v171_v30 = vsel %vm170_vm9, %v167_v28, %v169_v29 }
 0x27f   : > { %172 = vst [vmem:[#allocation2] sm:$0xff] %v171_v30 }
 0x286   : > { %v176_v31 = vld [vmem:[#allocation2] sm:$0xf] }
 0x287   : > { %178 = vst [vmem:[%s106_s21] sm:$0xf] %v176_v31 }
 0x28e   : > { %v203_v32 = vld [vmem:[%s106_s21] sm:$0xf] }
 0x28f   : > { %204 = vst [vmem:[%s187_s25] sm:$0xf] %v203_v32 }
 0x290 PF: > { %s7_s8 = sadd.s32 1, %s339_s8   ;;  %s401_s6 = smov %s335_s7 }
 0x291   : > { %p4_p5 = scmp.ge.s32.totalorder %s7_s8, 4   ;;  %s402_s7 = smov %s404_s10 }
 0x293   :  { %6 = sbr.rel (!%p4_p5) target bundleno = 2 (0x2), region = 112 }

// kernel: stagenet_forward.1
= control target key start
LH: loop header
LB: loop body
LE: loop exit
PB: predicated region body
PF: predicated region fallthrough
CT: control target
= control target key end

     0   :  { %14 = vsyncpa [#allocation3], 0  ;;  %s2655_s0 = inlined_call_operand.vmem [shape: bf16[2,4,2,256], index: 0, kind: input, shape index: {}]   ;;  %s2656_s1 = inlined_call_operand.vmem [shape: bf16[2,8,16,256], index: 1, kind: input, shape index: {}]   ;;  %s2657_s2 = inlined_call_operand.vmem [shape: f32[2,8], index: 2, kind: input, shape index: {}]   ;;  %s2658_s3 = inlined_call_operand.vmem [shape: f32[5], index: 3, kind: input, shape index: {}]   ;;  %s2659_s4 = inlined_call_operand.vmem [shape: f32[2,8,256], index: 4, kind: output, shape index: {0}]   ;;  %s2660_s5 = inlined_call_operand.vmem [shape: f32[2,8,256], index: 5, kind: output, shape index: {1}]   ;;  %s2661_s6 = inlined_call_operand.vmem [shape: f32[2,1,256], index: 6, kind: output, shape index: {2}]   ;;  %s2662_s7 = inlined_call_operand.vmem [shape: f32[2,1,256], index: 7, kind: output, shape index: {3}]   ;;  %s2663_s8 = inlined_call_operand.vmem [shape: f32[2,1,256], index: 8, kind: output, shape index: {4}]  }
   0x1   :  { %15 = vsyncpa [#allocation5], 0  ;;  %s1972_s27 = smov 0   ;;  %s1974_s28 = smov 0  }
   0x2   :  { %s1976_s29 = smov 0  }
   0x3 LB: > { %s1639_s30 = sadd.s32 4294967295, %s1921_s29   ;;  %s33_s9 = sadd.s32 1, %s1917_s28  ;;  %s1921_s29 = sphi %s1976_s29, %s21_s29   ;;  %s1917_s28 = sphi %s1974_s28, %s2685_s28   ;;  %s1913_s27 = sphi %s1972_s27, %s2684_s27  }
   0x4   : > { %p35_p0 = scmp.ge.s32.totalorder %s33_s9, 2  ;;  %p1641_p1 = scmp.ge.s32.totalorder %s1921_s29, 1 }
   0x5   : > { %p276_p2 = scmp.lt.s32.totalorder %s1921_s29, 3  ;;  %p1997_p4 = scmp.eq.s32.totalorder %s1639_s30, 0 }
   0x6   : > { %s2687_s9 = smov (%p35_p0, %s33_s9), 0  ;;  %s289_s14 = sshll.u32 %s2657_s2, 4  ;;  %s290_s14 = int_to_ptr.vmem [resolvable:$true] %s289_s14 }
   0x7   : > { %p1993_p3 = pnand %p1641_p1, %p276_p2  ;;  %s300_s17 = sshll.u32 %s2658_s3, 4  ;;  %s301_s17 = int_to_ptr.vmem [resolvable:$true] %s300_s17 }
   0x8   : > { %s2671_s11 = scalar_select %p1997_p4, 1, 0 }
   0x9   : > { %s2670_s10 = scalar_select %p1993_p3, 1, 0 }
   0xa   : > { %p1693_p5 = pneg %p1993_p3  ;;  %s1781_s19 = scalar_lea.vmem %s290_s14, 32 }
   0xb   : > { %p1782_p7 = scmp.ne.s32.totalorder %s290_s14, %s1781_s19  ;;  %p1789_p11 = scmp.lt.s32.totalorder %s290_s14, %s290_s14 }
   0xc   : > { %p2011_p6 = pnand %p1997_p4, %p1693_p5  ;;  %p1790_p12 = scmp.lt.s32.totalorder %s1781_s19, %s1781_s19 }
   0xe   : > { %p1783_p8 = pneg %p2011_p6  ;;  %p1791_p13 = por %p1790_p12, %p1789_p11 }
  0x10   : > { %p1784_p9 = pnand %p1783_p8, %p1782_p7 }
  0x12   : > { %p1785_p10 = pneg %p1784_p9 }
  0x14   : > { %p1792_p0 = pnand %p1791_p13, %p1785_p10 }
  0x16   : > { %1795 = shalt.err (!%p1792_p0)
}
  0x17   : > { %s1923_s20 = smov [#allocation2]   ;;  %s1796_s21 = scalar_lea.vmem %s301_s17, 16 }
  0x18   : > { %1696 = dma.vmem_to_smem (!%p2011_p6), %s290_s14, 32, %s1923_s20, [#allocation3]  }
  0x19   : > { %p1797_p1 = scmp.ne.s32.totalorder %s301_s17, %s1796_s21  ;;  %p1804_p4 = scmp.lt.s32.totalorder %s301_s17, %s301_s17 }
  0x1a   : > { %p1805_p3 = scmp.lt.s32.totalorder %s1796_s21, %s1796_s21 }
  0x1b   : > { %p1799_p2 = pnand %p1797_p1, %p1783_p8 }
  0x1c   : > { %p1806_p7 = por %p1805_p3, %p1804_p4 }
  0x1d   : > { %p1800_p5 = pneg %p1799_p2 }
  0x1f   : > { %p1807_p9 = pnand %p1806_p7, %p1800_p5 }
  0x21   : > { %1810 = shalt.err (!%p1807_p9)
}
  0x22   : > { %s1924_s22 = smov [#allocation4]   ;;  %p2673_p10 = scmp.ne.s32.totalorder %s2670_s10, 0 }
  0x23   : > { %1699 = dma.vmem_to_smem (!%p2011_p6), %s301_s17, 16, %s1924_s22, [#allocation5]  }
  0x24   : > { %338 = sbr.rel (%p2673_p10) target bundleno = 261 (0x105), region = 36 }
  0x2b   : > { %p2674_p11 = scmp.ne.s32.totalorder %s2671_s11, 0 }
  0x2d   : > { %1824 = dma.done.wait (%p2674_p11), [#allocation3], 32  }
  0x2e   : > { %1826 = vsyncadd (%p2674_p11), [#allocation3], 4294967264 }
  0x2f   : > { %1828 = dma.done.wait (%p2674_p11), [#allocation5], 16  }
  0x30   : > { %1830 = vsyncadd (%p2674_p11), [#allocation5], 4294967280 }
  0x31   : > { %348 = sfence }
  0x32   : > { %p427_p3 = scmp.lt.s32.totalorder %s1913_s27, 1  ;;  %v2667_v0 = vlaneseq  ;;  %v1925_v1 = vmov 1966171168   ;;  %s2054_s14 = sld [smem:[#allocation4]] }
  0x33   : > { %v520_v2 = vunpack.c.l.s4 %v1925_v1  ;;  %s2070_s15 = sld [smem:[#allocation4 + $0x1]]  ;;  %s2129_s18 = sld [smem:[#allocation4 + $0x2]] }
  0x34   : > { %s2033_s23 = scalar_select %p427_p3, %s1913_s27, 1  ;;  %v2036_v3 = vshrl.u32 %v2667_v0, 7 }
  0x35   : > { %v521_v4 = vunpack.c.0.s8 %v520_v2  ;;  %s2187_s20 = sld [smem:[#allocation4 + $0x3]]  ;;  %s2478_s22 = sshll.u32 %s1913_s27, 7 }
  0x36   : > { %2675 = vst [vmem:[#allocation8_spill] sm:$0xff] %v2036_v3  ;;  %s1648_s24 = sshll.u32 %s2033_s23, 3  ;;  %s1682_s25 = sshll.u32 %s2033_s23, 7  ;;  %v2061_v10 = vsub.s32 0, %v2036_v3  ;;  %v2064_v11 = vsub.s32 1, %v2036_v3 }
  0x37   : > { %s2043_s10 = scalar_lea.vmem %s2655_s0, %s1648_s24  ;;  %s2048_s13 = scalar_lea.vmem %s2656_s1, %s1682_s25  ;;  %v2052_v6 = vsub.s32 %v521_v4, %v2036_v3 }
  0x38   : > { %v492_v5 = vld [vmem:[%s2043_s10] sm:$0x3]  ;;  %v1658_v8 = vld [vmem:[%s2043_s10 + $0x2] sm:$0x3]  ;;  %v2067_v12 = vld [vmem:[%s2048_s13 + $0x8] sm:$0xff]  ;;  %s558_s16 = smul.f32 0.5, %s2054_s14 }
  0x39   : > { %v493_v7 = vunpack.c.l.bf16 %v492_v5  ;;  %v2058_v9 = vld [vmem:[%s2048_s13] sm:$0xff]  ;;  %v497_v14 = vunpack.c.l.bf16 %v1658_v8  ;;  %v516_v17 = vunpack.c.l.bf16 %v2067_v12  ;;  %v2082_v21 = vld [vmem:[%s2048_s13 + $0x10] sm:$0xff]  ;;  %v2085_v22 = vld [vmem:[%s2048_s13 + $0x18] sm:$0xff]  ;;  %v517_v23 = vunpack.c.h.bf16 %v2067_v12  ;;  %s619_s17 = smul.f32 0.5, %s2070_s15  ;;  %s1118_s27 = sadd.s32 1, %s2478_s22 }
  0x3a   : > { %v514_v15 = vunpack.c.l.bf16 %v2058_v9  ;;  %v515_v16 = vunpack.c.h.bf16 %v2058_v9  ;;  %v565_v26 = vunpack.c.l.bf16 %v2082_v21  ;;  %v566_v27 = vunpack.c.h.bf16 %v2082_v21  ;;  %v1659_v34 = vld [vmem:[%s2043_s10 + $0x4] sm:$0x3]  ;;  %v1660_v54 = vld [vmem:[%s2043_s10 + $0x6] sm:$0x3]  ;;  %v2153_v56 = vld [vmem:[%s2048_s13 + $0x28] sm:$0xff]  ;;  %s682_s19 = smul.f32 0.5, %s2129_s18 }
  0x3b   : > { %v525_v13 = vrot.slane %v493_v7, %v2052_v6  ;;  %v567_v28 = vunpack.c.l.bf16 %v2085_v22  ;;  %v576_v29 = vrot.slane %v497_v14, %v2052_v6  ;;  %v568_v33 = vunpack.c.h.bf16 %v2085_v22  ;;  %v2147_v51 = vld [vmem:[%s2048_s13 + $0x20] sm:$0xff]  ;;  %s745_s21 = smul.f32 0.5, %s2187_s20  ;;  %s1131_s24 = sadd.s32 2, %s2478_s22 }
  0x3c   : > { %v494_v39 = vmul.f32 %v493_v7, %v493_v7  ;;  %v498_v40 = vmul.f32 %v497_v14, %v497_v14  ;;  %v502_v44 = vunpack.c.l.bf16 %v1659_v34  ;;  %v2131_v45 = vstv %s558_s16  ;;  %v1667_v34 = vld [vmem:[%s2048_s13 + $0x30] sm:$0xff]  ;;  %s1144_s25 = sadd.s32 3, %s2478_s22  ;;  %s1157_s26 = sadd.s32 4, %s2478_s22 }
  0x3d   : > { %v526_v18 = vcombine.high %v525_v13, %v525_v13  ;;  %v2076_v19 = vrot.slane %v525_v13, %v2061_v10  ;;  %v2079_v20 = vrot.slane %v525_v13, %v2064_v11  ;;  %v577_v36 = vcombine.high %v576_v29, %v576_v29  ;;  %s1170_s30 = sadd.s32 5, %s2478_s22  ;;  %s1183_s10 = sadd.s32 6, %s2478_s22 }
  0x3e   : > { %v2114_v37 = vrot.slane %v576_v29, %v2061_v10  ;;  %v2117_v38 = vrot.slane %v576_v29, %v2064_v11  ;;  %v499_v52 = vadd.f32 %v498_v40, %v494_v39  ;;  %v503_v53 = vmul.f32 %v502_v44, %v502_v44  ;;  %v2199_v39 = vld [vmem:[%s2048_s13 + $0x38] sm:$0xff]  ;;  %s2495_s11 = sld [smem:[#allocation2 + %s2478_s22]]  ;;  %s1196_s12 = sadd.s32 7, %s2478_s22 }
  0x3f   : > { %v2089_v24 = vrot.slane %v526_v18, %v2061_v10  ;;  %v2092_v25 = vrot.slane %v526_v18, %v2064_v11  ;;  %v2099_v30 = vmul.f32 %v2076_v19, %v514_v15  ;;  %v2102_v31 = vmul.f32 %v2079_v20, %v515_v16  ;;  %s2506_s14 = sld [smem:[#allocation2 + %s1131_s24]]  ;;  %s2544_s20 = sshll.u32 %s2033_s23, 1 }
  0x40   : > { %v2121_v41 = vrot.slane %v577_v36, %v2061_v10  ;;  %v2124_v42 = vrot.slane %v577_v36, %v2064_v11  ;;  %v2127_v43 = vmul.f32 %v2114_v37, %v565_v26  ;;  %v2134_v46 = vmul.f32 %v2117_v38, %v566_v27  ;;  %s2510_s15 = sld [smem:[#allocation2 + %s1144_s25]] }
  0x41   : > { %v2105_v32 = vmul.f32 %v2089_v24, %v516_v17  ;;  %v2111_v35 = vmul.f32 %v2092_v25, %v517_v23  ;;  %v2150_v55 = vstv %s619_s17  ;;  %v628_v61 = vunpack.c.l.bf16 %v2147_v51  ;;  %s2514_s16 = sld [smem:[#allocation2 + %s1157_s26]] }
  0x42   : > { %v2141_v49 = vmul.f32 %v2121_v41, %v567_v28  ;;  %v2144_v50 = vmul.f32 %v2124_v42, %v568_v33  ;;  %v629_v62 = vunpack.c.h.bf16 %v2147_v51  ;;  %v639_v63 = vrot.slane %v502_v44, %v2052_v6  ;;  %s2518_s17 = sld [smem:[#allocation2 + %s1170_s30]] }
  0x43   : > { %v555_v47 = vadd.f32 %v2105_v32, %v2099_v30  ;;  %v556_v48 = vadd.f32 %v2111_v35, %v2102_v31  ;;  %v507_v1 = vunpack.c.l.bf16 %v1660_v54  ;;  %v630_v5 = vunpack.c.l.bf16 %v2153_v56  ;;  %s2522_s18 = sld [smem:[#allocation2 + %s1183_s10]] }
  0x44   : > { %v614_v59 = vadd.f32 %v2141_v49, %v2127_v43  ;;  %v615_v60 = vadd.f32 %v2144_v50, %v2134_v46  ;;  %v631_v7 = vunpack.c.h.bf16 %v2153_v56  ;;  %v640_v8 = vcombine.high %v639_v63, %v639_v63 }
  0x45   : > { %v560_v57 = vmul.f32 %v2131_v45, %v555_v47  ;;  %v561_v58 = vmul.f32 %v2131_v45, %v556_v48  ;;  %v2169_v13 = vrot.slane %v639_v63, %v2061_v10  ;;  %v2172_v14 = vrot.slane %v639_v63, %v2064_v11 }
  0x46   : > { %v621_v2 = vmul.f32 %v2150_v55, %v614_v59  ;;  %v622_v4 = vmul.f32 %v2150_v55, %v615_v60  ;;  %v504_v15 = vadd.f32 %v503_v53, %v499_v52  ;;  %v508_v16 = vmul.f32 %v507_v1, %v507_v1 }
  0x47   : > { %v2176_v23 = vrot.slane %v640_v8, %v2061_v10  ;;  %v2179_v26 = vrot.slane %v640_v8, %v2064_v11  ;;  %v2182_v27 = vmul.f32 %v2169_v13, %v628_v61  ;;  %v2185_v28 = vmul.f32 %v2172_v14, %v629_v62 }
  0x48   : > { %v623_v17 = vadd.f32 %v621_v2, %v560_v57  ;;  %v624_v18 = vadd.f32 %v622_v4, %v561_v58  ;;  %v2196_v36 = vstv %s682_s19  ;;  %v509_v40 = vadd.f32 %v508_v16, %v504_v15  ;;  %s2526_s19 = sld [smem:[#allocation2 + %s1196_s12]] }
  0x49   : > { %v2190_v29 = vmul.f32 %v2176_v23, %v630_v5  ;;  %v2193_v33 = vmul.f32 %v2179_v26, %v631_v7  ;;  %v616_v53 = vadd.f32 %v614_v59, %v555_v47  ;;  %v691_v54 = vunpack.c.l.bf16 %v1667_v34 }
  0x4a   : > { %v692_v57 = vunpack.c.h.bf16 %v1667_v34  ;;  %v702_v58 = vrot.slane %v507_v1, %v2052_v6  ;;  %v617_v61 = vadd.f32 %v615_v60, %v556_v48  ;;  %v693_v2 = vunpack.c.l.bf16 %v2199_v39 }
  0x4b   : > { %v677_v44 = vadd.f32 %v2190_v29, %v2182_v27  ;;  %v678_v52 = vadd.f32 %v2193_v33, %v2185_v28  ;;  %v694_v4 = vunpack.c.h.bf16 %v2199_v39  ;;  %v510_v47 = vmax.f32 %v509_v40, 1e-24 }
  0x4c   : > { %v703_v5 = vcombine.high %v702_v58, %v702_v58  ;;  %v2211_v7 = vrot.slane %v702_v58, %v2061_v10  ;;  %v2214_v8 = vrot.slane %v702_v58, %v2064_v11  ;;  %1891 = vmul.bf16.f32.vacc3 %v2058_v9, %v2058_v9 }
  0x4d   : > { %v684_v62 = vmul.f32 %v2196_v36, %v677_v44  ;;  %v685_v63 = vmul.f32 %v2196_v36, %v678_v52  ;;  %1892 = vmac.bf16.f32.vacc3 %v2082_v21, %v2082_v21  ;;  %1871 = vmul.bf16.f32.vacc2 %v2067_v12, %v2067_v12 }
  0x4e   : > { %v2218_v48 = vrot.slane %v703_v5, %v2061_v10  ;;  %v2221_v60 = vrot.slane %v703_v5, %v2064_v11  ;;  %v2224_v1 = vmul.f32 %v2211_v7, %v691_v54  ;;  %v2227_v16 = vmul.f32 %v2214_v8, %v692_v57 }
  0x4f   : > { %v686_v59 = vadd.f32 %v684_v62, %v623_v17  ;;  %v687_v15 = vadd.f32 %v685_v63, %v624_v18  ;;  %v679_v17 = vadd.f32 %v677_v44, %v616_v53  ;;  %v680_v18 = vadd.f32 %v678_v52, %v617_v61 }
  0x50   : > { %v2234_v40 = vmul.f32 %v2218_v48, %v693_v2  ;;  %v2237_v58 = vmul.f32 %v2221_v60, %v694_v4  ;;  %v2239_v62 = vstv %s745_s21  ;;  %1731 = vrsqrt.f32 %v510_v47  ;;  %v2266_v4 = vld [vmem:[%s2048_s13 + $0x40] sm:$0xff]  ;;  %v2273_v47 = vld [vmem:[%s2048_s13 + $0x48] sm:$0xff]  ;;  %s1119_s21 = sld [smem:[#allocation2 + %s1118_s27]] }
  0x51   : > { %1872 = vmac.bf16.f32.vacc2 %v2085_v22, %v2085_v22  ;;  %1893 = vmac.bf16.f32.vacc3 %v2147_v51, %v2147_v51  ;;  %v602_v22 = vadd.f32 %v2127_v43, %v2099_v30  ;;  %v603_v2 = vadd.f32 %v2134_v46, %v2102_v31 }
  0x52   : > { %v740_v54 = vadd.f32 %v2234_v40, %v2224_v1  ;;  %v741_v9 = vadd.f32 %v2237_v58, %v2227_v16  ;;  %1873 = vmac.bf16.f32.vacc2 %v2153_v56, %v2153_v56  ;;  %1894 = vmac.bf16.f32.vacc3 %v1667_v34, %v1667_v34 }
  0x53   : > { %v1926_v30 = vmov 1935823168   ;;  %1874 = vmac.bf16.f32.vacc2 %v2199_v39, %v2199_v39  ;;  %1851 = vmul.bf16.f32.vacc1 %v2266_v4, %v2266_v4  ;;  %1831 = vmul.bf16.f32.vacc0 %v2273_v47, %v2273_v47 }
  0x54   : > { %v742_v21 = vadd.f32 %v740_v54, %v679_v17  ;;  %v743_v44 = vadd.f32 %v741_v9, %v680_v18  ;;  %v747_v52 = vmul.f32 %v2239_v62, %v740_v54  ;;  %v748_v53 = vmul.f32 %v2239_v62, %v741_v9 }
  0x55   : > { %v1899_v43 = vunpack.c.l.s4 %v1926_v30 }
  0x56   : > { %v2253_v57 = vadd.f32 %v747_v52, %v686_v59  ;;  %v2255_v61 = vadd.f32 %v748_v53, %v687_v15  ;;  %v2257_v63 = vmul.f32 0.25, %v742_v21  ;;  %v2259_v12 = vmul.f32 0.25, %v743_v44 }
  0x57   : > { %v1895_v59 = vmovacc.add.low.vacc3  ;;  %v1900_v54 = vunpack.c.0.s8 %v1899_v43  ;;  %v847_v21 = vunpack.c.l.bf16 %v2266_v4  ;;  %v848_v44 = vunpack.c.h.bf16 %v2266_v4  ;;  %v1672_v43 = vld [vmem:[%s2048_s13 + $0x50] sm:$0xff] }
  0x58   : > { %2676 = vst [vmem:[#allocation9_spill] sm:$0xff] %v2253_v57  ;;  %2677 = vst [vmem:[#allocation10_spill] sm:$0xff] %v2255_v61  ;;  %v753_v51 = vrot.slane %v2257_v63, 4  ;;  %v759_v5 = vrot.slane %v2259_v12, 4  ;;  %v1896_v15 = vmovacc.add.high.vacc3  ;;  %v604_v52 = vadd.f32 %v2141_v49, %v2105_v32 }
  0x59   : > { %v2276_v31 = vsub.s32 %v1900_v54, %v2036_v3  ;;  %v2288_v53 = vadd.f32 %v2144_v50, %v2111_v35  ;;  %v2300_v54 = vld [vmem:[%s2048_s13 + $0x58] sm:$0xff]  ;;  %v1875_v32 = vmovacc.add.low.vacc2  ;;  %v2311_v57 = vmul.f32 %v847_v21, %v2076_v19 }
  0x5a   : > { %v1897_v17 = vcombine.low %v1895_v59, %v1896_v15  ;;  %v1898_v18 = vcombine.high %v1895_v59, %v1896_v15  ;;  %v754_v9 = vmax.f32 %v2257_v63, %v753_v51  ;;  %v760_v34 = vmax.f32 %v2259_v12, %v759_v5 }
  0x5b   : > { %v849_v59 = vunpack.c.l.bf16 %v2273_v47  ;;  %v850_v15 = vunpack.c.h.bf16 %v2273_v47  ;;  %v2293_v51 = vadd.f32 %v2182_v27, %v602_v22  ;;  %v2296_v5 = vadd.f32 %v2185_v28, %v603_v2 }
  0x5c   : > { %v1904_v46 = vrot.slane %v1897_v17, %v2276_v31  ;;  %v1910_v56 = vrot.slane %v1898_v18, %v2276_v31  ;;  %v1732_v17 = vpop.eup %1731  ;;  %v755_v18 = vrot.slane %v754_v9, 2  ;;  %v761_v30 = vrot.slane %v760_v34, 2 }
  0x5d   : > { %v1876_v35 = vmovacc.add.high.vacc2  ;;  %v2314_v3 = vmul.f32 %v848_v44, %v2079_v20  ;;  %v2317_v39 = vmul.f32 %v849_v59, %v2089_v24  ;;  %v2325_v19 = vadd.f32 %v2190_v29, %v604_v52 }
  0x5e   : > { %v795_v28 = vmax.f32 %v1904_v46, 1e-24  ;;  %v796_v22 = vmax.f32 %v1910_v56, 1e-24  ;;  %v756_v2 = vmax.f32 %v754_v9, %v755_v18  ;;  %v762_v61 = vmax.f32 %v760_v34, %v761_v30  ;;  %v1675_v30 = vld [vmem:[%s2048_s13 + $0x68] sm:$0xff] }
  0x5f   : > { %v1877_v49 = vcombine.low %v1875_v32, %v1876_v35  ;;  %v1878_v50 = vcombine.high %v1875_v32, %v1876_v35  ;;  %v2320_v32 = vmul.f32 %v850_v15, %v2092_v25  ;;  %v866_v35 = vunpack.c.l.bf16 %v1672_v43 }
  0x60   : > { %v763_v46 = vrot.slane %v762_v61, 1  ;;  %v867_v56 = vunpack.c.h.bf16 %v1672_v43  ;;  %v869_v9 = vunpack.c.h.bf16 %v2300_v54  ;;  %1733 = vrsqrt.f32 %v795_v28 }
  0x61   : > { %v2305_v0 = vrot.slane %v1877_v49, %v2276_v31  ;;  %v2308_v27 = vrot.slane %v1878_v50, %v2276_v31  ;;  %v868_v49 = vunpack.c.l.bf16 %v2300_v54  ;;  %v757_v50 = vrot.slane %v756_v2, 1 }
  0x62   : > { %v764_v34 = vmax.f32 %v762_v61, %v763_v46  ;;  %1735 = vrsqrt.f32 %v796_v22  ;;  %v2330_v21 = vrot.slane %v1732_v17, %v2052_v6  ;;  %v859_v44 = vadd.f32 %v2317_v39, %v2311_v57  ;;  %v1674_v17 = vld [vmem:[%s2048_s13 + $0x60] sm:$0xff] }
  0x63   : > { %v797_v20 = vmax.f32 %v2305_v0, 1e-24  ;;  %v798_v24 = vmax.f32 %v2308_v27, 1e-24  ;;  %v758_v25 = vmax.f32 %v756_v2, %v757_v50  ;;  %v2335_v59 = vmul.f32 %v866_v35, %v2114_v37 }
  0x64   : > { %v2338_v29 = vmul.f32 %v868_v49, %v2121_v41  ;;  %v860_v52 = vadd.f32 %v2320_v32, %v2314_v3  ;;  %v2344_v61 = vmul.f32 %v867_v56, %v2117_v38  ;;  %v2347_v15 = vmul.f32 %v869_v9, %v2124_v42 }
  0x65   : > { %v765_v0 = vsub.f32 %v2257_v63, %v758_v25  ;;  %v766_v18 = vsub.f32 %v2259_v12, %v764_v34  ;;  %v861_v37 = vmul.f32 %v859_v44, %v2131_v45  ;;  %v897_v22 = vunpack.c.l.bf16 %v1674_v17 }
  0x66   : > { %v862_v41 = vmul.f32 %v860_v52, %v2131_v45  ;;  %v886_v63 = vadd.f32 %v2338_v29, %v2335_v59  ;;  %v887_v38 = vadd.f32 %v2347_v15, %v2344_v61  ;;  %v898_v2 = vunpack.c.h.bf16 %v1674_v17 }
  0x67   : > { %v767_v28 = vmul.f32 1.442695, %v765_v0  ;;  %v899_v42 = vunpack.c.l.bf16 %v1675_v30  ;;  %v900_v35 = vunpack.c.h.bf16 %v1675_v30  ;;  %v769_v49 = vmul.f32 1.442695, %v766_v18 }
  0x68   : > { %1852 = vmac.bf16.f32.vacc1 %v1672_v43, %v1672_v43  ;;  %v890_v45 = vmul.f32 %v886_v63, %v2150_v55  ;;  %v891_v12 = vmul.f32 %v887_v38, %v2150_v55  ;;  %v2363_v50 = vmul.f32 %v897_v22, %v2169_v13  ;;  %v1676_v43 = vld [vmem:[%s2048_s13 + $0x70] sm:$0xff]  ;;  %v1677_v13 = vld [vmem:[%s2048_s13 + $0x78] sm:$0xff]  ;;  %s2501_s13 = sld [smem:[#allocation2 + %s1118_s27]] }
  0x69   : > { %v2366_v46 = vmul.f32 %v898_v2, %v2172_v14  ;;  %v2369_v56 = vmul.f32 %v899_v42, %v2176_v23  ;;  %v2374_v4 = vmul.f32 %v900_v35, %v2179_v26  ;;  %1737 = vpow2.f32 %v767_v28  ;;  %s2591_s27 = sld [smem:[#allocation2 + %s1196_s12]] }
  0x6a   : > { %v2371_v9 = vpop.eup %1733  ;;  %v892_v25 = vadd.f32 %v890_v45, %v861_v37  ;;  %1832 = vmac.bf16.f32.vacc0 %v2300_v54, %v2300_v54  ;;  %v893_v55 = vadd.f32 %v891_v12, %v862_v41  ;;  %1739 = vpow2.f32 %v769_v49 }
  0x6b   : > { %v888_v14 = vadd.f32 %v886_v63, %v859_v44  ;;  %v917_v23 = vadd.f32 %v2369_v56, %v2363_v50  ;;  %v918_v26 = vadd.f32 %v2374_v4, %v2366_v46  ;;  %v928_v0 = vunpack.c.l.bf16 %v1676_v43 }
  0x6c   : > { %v2377_v34 = vpop.eup %1735  ;;  %v889_v18 = vadd.f32 %v887_v38, %v860_v52  ;;  %1853 = vmac.bf16.f32.vacc1 %v1674_v17, %v1674_v17  ;;  %v929_v37 = vunpack.c.h.bf16 %v1676_v43  ;;  %v930_v28 = vunpack.c.l.bf16 %v1677_v13 }
  0x6d   : > { %1833 = vmac.bf16.f32.vacc0 %v1675_v30, %v1675_v30  ;;  %v921_v47 = vmul.f32 %v917_v23, %v2196_v36  ;;  %v922_v54 = vmul.f32 %v918_v26, %v2196_v36  ;;  %v931_v41 = vunpack.c.h.bf16 %v1677_v13 }
  0x6e   : > { %v2391_v22 = vmul.f32 %v928_v0, %v2211_v7  ;;  %v2394_v44 = vmul.f32 %v930_v28, %v2218_v48  ;;  %v2398_v52 = vadd.f32 %v2193_v33, %v2288_v53  ;;  %1741 = vrsqrt.f32 %v797_v20 }
  0x6f   : > { %v923_v63 = vadd.f32 %v921_v47, %v892_v25  ;;  %v924_v2 = vadd.f32 %v922_v54, %v893_v55  ;;  %v2401_v17 = vmul.f32 %v929_v37, %v2214_v8  ;;  %v2404_v30 = vmul.f32 %v931_v41, %v2221_v60 }
  0x70   : > { %v2408_v36 = vadd.f32 %v2224_v1, %v2293_v51  ;;  %v919_v7 = vadd.f32 %v917_v23, %v888_v14  ;;  %1743 = vrsqrt.f32 %v798_v24  ;;  %v920_v48 = vadd.f32 %v918_v26, %v889_v18 }
  0x71   : > { %1854 = vmac.bf16.f32.vacc1 %v1676_v43, %v1676_v43  ;;  %v811_v1 = vcombine.high %v2330_v21, %v2330_v21  ;;  %1834 = vmac.bf16.f32.vacc0 %v1677_v13, %v1677_v13  ;;  %v948_v12 = vadd.f32 %v2394_v44, %v2391_v22 }
  0x72   : > { %v729_v43 = vadd.f32 %v2227_v16, %v2296_v5  ;;  %v949_v55 = vadd.f32 %v2404_v30, %v2401_v17  ;;  %v815_v23 = vrot.slane %v2330_v21, %v2061_v10  ;;  %v819_v18 = vrot.slane %v2330_v21, %v2064_v11 }
  0x73   : > { %v1855_v38 = vmovacc.add.low.vacc1  ;;  %v2414_v60 = vpop.eup %1737  ;;  %v1835_v51 = vmovacc.add.low.vacc0  ;;  %v950_v26 = vadd.f32 %v948_v12, %v919_v7  ;;  %v952_v0 = vmul.f32 %v948_v12, %v2239_v62 }
  0x74   : > { %v1856_v33 = vmovacc.add.high.vacc1  ;;  %v1836_v35 = vmovacc.add.high.vacc0  ;;  %v2422_v25 = vpop.eup %1739  ;;  %v951_v37 = vadd.f32 %v949_v55, %v920_v48  ;;  %v953_v28 = vmul.f32 %v949_v55, %v2239_v62 }
  0x75   : > { %v823_v16 = vrot.slane %v811_v1, %v2061_v10  ;;  %v2435_v5 = vadd.f32 %v952_v0, %v923_v63  ;;  %v2437_v54 = vmul.f32 0.25, %v950_v26  ;;  %v874_v41 = vadd.f32 %v2335_v59, %v2311_v57 }
  0x76   : > { %v1857_v53 = vcombine.low %v1855_v38, %v1856_v33  ;;  %v1858_v20 = vcombine.high %v1855_v38, %v1856_v33  ;;  %v1837_v27 = vcombine.low %v1835_v51, %v1836_v35  ;;  %v1838_v24 = vcombine.high %v1835_v51, %v1836_v35 }
  0x77   : > { %v2441_v7 = vadd.f32 %v953_v28, %v924_v2  ;;  %v2443_v38 = vmul.f32 0.25, %v951_v37  ;;  %v771_v21 = vrot.slane %v2414_v60, 4  ;;  %v875_v62 = vadd.f32 %v2344_v61, %v2314_v3 }
  0x78   : > { %v1864_v8 = vrot.slane %v1857_v53, %v2276_v31  ;;  %v1870_v42 = vrot.slane %v1858_v20, %v2276_v31  ;;  %v1844_v49 = vrot.slane %v1837_v27, %v2276_v31  ;;  %v1850_v45 = vrot.slane %v1838_v24, %v2276_v31  ;;  %v1742_v63 = vpop.eup %1741 }
  0x79   : > { %v958_v10 = vrot.slane %v2437_v54, 4  ;;  %v777_v48 = vrot.slane %v2422_v25, 4  ;;  %v876_v33 = vadd.f32 %v2338_v29, %v2317_v39  ;;  %v964_v57 = vrot.slane %v2443_v38, 4 }
  0x7a   : > { %v1000_v13 = vmax.f32 %v1864_v8, 1e-24  ;;  %v1001_v14 = vmax.f32 %v1870_v42, 1e-24  ;;  %v1002_v31 = vmax.f32 %v1844_v49, 1e-24  ;;  %v730_v59 = vadd.f32 %v2234_v40, %v2325_v19  ;;  %v1744_v53 = vpop.eup %1743 }
  0x7b   : > { %v1003_v47 = vmax.f32 %v1850_v45, 1e-24  ;;  %v827_v2 = vrot.slane %v811_v1, %v2064_v11  ;;  %v877_v3 = vadd.f32 %v2347_v15, %v2320_v32  ;;  %v959_v61 = vmax.f32 %v2437_v54, %v958_v10 }
  0x7c   : > { %1745 = vrsqrt.f32 %v1000_v13  ;;  %v832_v20 = vmul.f32 %v2371_v9, %v815_v23  ;;  %v833_v8 = vmul.f32 %v2377_v34, %v819_v18  ;;  %v905_v39 = vadd.f32 %v2363_v50, %v874_v41 }
  0x7d   : > { %1747 = vrsqrt.f32 %v1001_v14  ;;  %v965_v29 = vmax.f32 %v2443_v38, %v964_v57  ;;  %v772_v42 = vadd.f32 %v2414_v60, %v771_v21  ;;  %v834_v51 = vmul.f32 %v1742_v63, %v823_v16 }
  0x7e   : > { %1749 = vrsqrt.f32 %v1002_v31  ;;  %v906_v40 = vadd.f32 %v2366_v46, %v875_v62  ;;  %v960_v11 = vrot.slane %v959_v61, 2  ;;  %v778_v19 = vadd.f32 %v2422_v25, %v777_v48 }
  0x7f   : > { %1751 = vrsqrt.f32 %v1003_v47  ;;  %v907_v32 = vadd.f32 %v2369_v56, %v876_v33  ;;  %v966_v15 = vrot.slane %v965_v29, 2  ;;  %v731_v9 = vadd.f32 %v2237_v58, %v2398_v52 }
  0x80   : > { %v835_v1 = vmul.f32 %v1744_v53, %v827_v2  ;;  %v908_v34 = vadd.f32 %v2374_v4, %v877_v3  ;;  %v961_v50 = vmax.f32 %v959_v61, %v960_v11  ;;  %v836_v35 = vmul.f32 %v832_v20, %v2408_v36 }
  0x81   : > { %v837_v27 = vmul.f32 %v833_v8, %v729_v43  ;;  %v936_v24 = vadd.f32 %v2391_v22, %v905_v39  ;;  %v967_v49 = vmax.f32 %v965_v29, %v966_v15  ;;  %v773_v45 = vrot.slane %v772_v42, 2 }
  0x82   : > { %v838_v12 = vmul.f32 %v834_v51, %v730_v59  ;;  %v937_v55 = vadd.f32 %v2401_v17, %v906_v40  ;;  %v962_v56 = vrot.slane %v961_v50, 1  ;;  %v779_v14 = vrot.slane %v778_v19, 2 }
  0x83   : > { %v938_v58 = vadd.f32 %v2394_v44, %v907_v32  ;;  %v968_v52 = vrot.slane %v967_v49, 1  ;;  %v839_v0 = vmul.f32 %v835_v1, %v731_v9  ;;  %v939_v36 = vadd.f32 %v2404_v30, %v908_v34 }
  0x84   : > { %v963_v43 = vmax.f32 %v961_v50, %v962_v56  ;;  %v774_v41 = vadd.f32 %v773_v45, %v772_v42  ;;  %v780_v10 = vadd.f32 %v779_v14, %v778_v19  ;;  %v840_v63 = vadd.f32 %v838_v12, %v836_v35 }
  0x85   : > { %v969_v37 = vmax.f32 %v967_v49, %v968_v52  ;;  %v841_v48 = vadd.f32 %v839_v0, %v837_v27 }
  0x86   : > { %v1746_v46 = vpop.eup %1745  ;;  %v970_v17 = vsub.f32 %v2437_v54, %v963_v43  ;;  %v781_v3 = vrot.slane %v780_v10, 1 }
  0x87   : > { %v1748_v13 = vpop.eup %1747  ;;  %v1008_v26 = vmul.f32 %v1746_v46, %v815_v23  ;;  %v971_v44 = vsub.f32 %v2443_v38, %v969_v37  ;;  %v2678_v46 = vld [vmem:[#allocation8_spill] sm:$0xff] }
  0x88   : > { %v1750_v4 = vpop.eup %1749  ;;  %v1009_v31 = vmul.f32 %v1748_v13, %v819_v18  ;;  %v972_v33 = vmul.f32 1.442695, %v970_v17  ;;  %v775_v18 = vrot.slane %v774_v41, 1  ;;  %v782_v8 = vadd.f32 %v781_v3, %v780_v10 }
  0x89   : > { %v1752_v22 = vpop.eup %1751  ;;  %v1010_v28 = vmul.f32 %v1750_v4, %v823_v16  ;;  %v1012_v47 = vmul.f32 %v1008_v26, %v936_v24  ;;  %v974_v30 = vmul.f32 1.442695, %v971_v44  ;;  %v1287_v44 = vstv %s2510_s15  ;;  %s1683_s15 = sshll.u32 %s2033_s23, 4 }
  0x8a   : > { %v1011_v21 = vmul.f32 %v1752_v22, %v827_v2  ;;  %v1013_v62 = vmul.f32 %v1009_v31, %v937_v55  ;;  %1753 = vpow2.f32 %v972_v33  ;;  %v776_v53 = vadd.f32 %v775_v18, %v774_v41 }
  0x8b   : > { %v1014_v23 = vmul.f32 %v1010_v28, %v938_v58  ;;  %1755 = vpow2.f32 %v974_v30  ;;  %v1269_v41 = vstv %s2495_s11  ;;  %v1299_v30 = vstv %s2518_s17  ;;  %s2571_s11 = sld [smem:[#allocation2 + %s1131_s24]] }
  0x8c   : > { %v1015_v57 = vmul.f32 %v1011_v21, %v939_v36  ;;  %1757 = vrcp.f32 %v776_v53  ;;  %v1275_v21 = vstv %s2501_s13  ;;  %v1311_v18 = vstv %s2526_s19  ;;  %s490_s13 = scalar_lea.vmem %s2663_s8, %s2544_s20  ;;  %s1112_s19 = sld [smem:[#allocation2 + %s2478_s22]] }
  0x8d   : > { %v1016_v59 = vadd.f32 %v1014_v23, %v1012_v47  ;;  %1759 = vrcp.f32 %v782_v8  ;;  %s2587_s17 = sld [smem:[#allocation2 + %s1183_s10]] }
  0x8e   : > { %v1017_v16 = vadd.f32 %v1015_v57, %v1013_v62  ;;  %v1293_v57 = vstv %s2514_s16  ;;  %s2583_s16 = sld [smem:[#allocation2 + %s1170_s30]]  ;;  %s481_s30 = scalar_lea.vmem %s2662_s7, %s2544_s20 }
  0x8f   : > { %v1018_v61 = vadd.f32 %v1016_v59, %v840_v63  ;;  %v1281_v63 = vstv %s2506_s14  ;;  %v1305_v59 = vstv %s2522_s18  ;;  %s1678_s14 = sld [smem:[#allocation4 + $0x4]]  ;;  %s453_s18 = scalar_lea.vmem %s2659_s4, %s1683_s15 }
  0x90   : > { %v1019_v54 = vadd.f32 %v1017_v16, %v841_v48  ;;  %v2679_v16 = vld [vmem:[#allocation9_spill] sm:$0xff] }
  0x91   : > { %v1230_v2 = vrot.slane %v1018_v61, 4 }
  0x92   : > { %v1236_v20 = vrot.slane %v1019_v54, 4 }
  0x93   : > { %v1231_v39 = vmax.f32 %v1018_v61, %v1230_v2 }
  0x94   : > { %v1237_v38 = vmax.f32 %v1019_v54, %v1236_v20  ;;  %v2480_v40 = vpop.eup %1753 }
  0x95   : > { %v1232_v29 = vrot.slane %v1231_v39, 2  ;;  %v2482_v19 = vpop.eup %1755  ;;  %v976_v32 = vrot.slane %v2480_v40, 4 }
  0x96   : > { %v1238_v42 = vrot.slane %v1237_v38, 2  ;;  %v982_v9 = vrot.slane %v2482_v19, 4  ;;  %v1758_v13 = vpop.eup %1757 }
  0x97   : > { %v1233_v51 = vmax.f32 %v1231_v39, %v1232_v29  ;;  %v977_v34 = vadd.f32 %v2480_v40, %v976_v32  ;;  %v1760_v52 = vpop.eup %1759  ;;  %v785_v22 = vmul.f32 0.35355338, %v1758_v13 }
  0x98   : > { %v1239_v11 = vmax.f32 %v1237_v38, %v1238_v42  ;;  %v983_v35 = vadd.f32 %v2482_v19, %v982_v9  ;;  %v786_v37 = vmul.f32 0.35355338, %v1760_v52 }
  0x99   : > { %v1234_v15 = vrot.slane %v1233_v51, 1  ;;  %v978_v24 = vrot.slane %v977_v34, 2  ;;  %v787_v23 = vmul.f32 %v2414_v60, %v785_v22 }
  0x9a   : > { %v1240_v1 = vrot.slane %v1239_v11, 1  ;;  %v984_v49 = vrot.slane %v983_v35, 2  ;;  %v788_v48 = vmul.f32 %v2422_v25, %v786_v37 }
  0x9b   : > { %v1235_v50 = vmax.f32 %v1233_v51, %v1234_v15  ;;  %v979_v12 = vadd.f32 %v978_v24, %v977_v34  ;;  %v789_v3 = vmul.f32 %v787_v23, %v2679_v16 }
  0x9c   : > { %v1241_v27 = vmax.f32 %v1239_v11, %v1240_v1  ;;  %v985_v14 = vadd.f32 %v984_v49, %v983_v35 }
  0x9d   : > { %vm1244_vm0 = vcmp.eq.f32.partialorder %v1018_v61, %v1235_v50  ;;  %v980_v26 = vrot.slane %v979_v12, 1  ;;  %v2680_v61 = vld [vmem:[#allocation10_spill] sm:$0xff] }
  0x9e   : > { %vm1245_vm1 = vcmp.eq.f32.partialorder %v1019_v54, %v1241_v27  ;;  %v1246_v45 = vsel %vm1244_vm0, %v2678_v46, 8  ;;  %v986_v4 = vrot.slane %v985_v14, 1  ;;  %v790_v54 = vmul.f32 %v788_v48, %v2680_v61 }
  0x9f   : > { %v1247_v55 = vsel %vm1245_vm1, %v2678_v46, 8  ;;  %v1248_v56 = vrot.slane %v1246_v45, 4  ;;  %v981_v36 = vadd.f32 %v980_v26, %v979_v12  ;;  %v1113_v61 = vstv %s1112_s19 }
  0xa0   : > { %v1257_v58 = vrot.slane %v1247_v55, 4  ;;  %v987_v28 = vadd.f32 %v986_v4, %v985_v14 }
  0xa1   : > { %vm1249_vm2 = vcmp.lt.s32.totalorder %v1246_v45, %v1248_v56  ;;  %1761 = vrcp.f32 %v981_v36  ;;  %v1027_v36 = vstv %s1678_s14  ;;  %s2579_s14 = sld [smem:[#allocation2 + %s1157_s26]] }
  0xa2   : > { %v1250_v0 = vsel %vm1249_vm2, %v1246_v45, %v1248_v56  ;;  %vm1258_vm3 = vcmp.lt.s32.totalorder %v1247_v55, %v1257_v58  ;;  %1763 = vrcp.f32 %v987_v28 }
  0xa3   : > { %v1251_v43 = vrot.slane %v1250_v0, 2  ;;  %v1259_v31 = vsel %vm1258_vm3, %v1247_v55, %v1257_v58 }
  0xa4   : > { %v1260_v47 = vrot.slane %v1259_v31, 2 }
  0xa5   : > { %vm1252_vm4 = vcmp.lt.s32.totalorder %v1250_v0, %v1251_v43 }
  0xa6   : > { %v1253_v17 = vsel %vm1252_vm4, %v1250_v0, %v1251_v43  ;;  %vm1261_vm5 = vcmp.lt.s32.totalorder %v1259_v31, %v1260_v47 }
  0xa7   : > { %v1254_v62 = vrot.slane %v1253_v17, 1  ;;  %v1262_v10 = vsel %vm1261_vm5, %v1259_v31, %v1260_v47 }
  0xa8   : > { %v1263_v33 = vrot.slane %v1262_v10, 1 }
  0xa9   : > { %vm1255_vm6 = vcmp.lt.s32.totalorder %v1253_v17, %v1254_v62 }
  0xaa   : > { %v1256_v2 = vsel %vm1255_vm6, %v1253_v17, %v1254_v62  ;;  %vm1264_vm7 = vcmp.lt.s32.totalorder %v1262_v10, %v1263_v33 }
  0xab   : > { %v1265_v53 = vsel %vm1264_vm7, %v1262_v10, %v1263_v33  ;;  %vm1266_vm8 = vcmp.eq.s32.totalorder %v1256_v2, 0  ;;  %vm1272_vm9 = vcmp.eq.s32.totalorder %v1256_v2, 1  ;;  %vm1278_vm10 = vcmp.eq.s32.totalorder %v1256_v2, 2  ;;  %v1762_v38 = vpop.eup %1761 }
  0xac   : > { %vm1267_vm11 = vcmp.eq.s32.totalorder %v1265_v53, 0  ;;  %v1270_v60 = vsel %vm1266_vm8, %v1269_v41, 0.0  ;;  %vm1273_vm12 = vcmp.eq.s32.totalorder %v1265_v53, 1  ;;  %vm1279_vm13 = vcmp.eq.s32.totalorder %v1265_v53, 2  ;;  %v1764_v51 = vpop.eup %1763 }
  0xad   : > { %v1271_v25 = vsel %vm1267_vm11, %v1269_v41, 0.0  ;;  %v1276_v20 = vsel %vm1272_vm9, %v1275_v21, %v1270_v60  ;;  %vm1284_vm14 = vcmp.eq.s32.totalorder %v1256_v2, 3  ;;  %vm1285_vm15 = vcmp.eq.s32.totalorder %v1265_v53, 3 }
  0xae   : > { %v1277_v8 = vsel %vm1273_vm12, %v1275_v21, %v1271_v25  ;;  %v1282_v39 = vsel %vm1278_vm10, %v1281_v63, %v1276_v20  ;;  %vm1290_vm0 = vcmp.eq.s32.totalorder %v1256_v2, 4  ;;  %vm1291_vm1 = vcmp.eq.s32.totalorder %v1265_v53, 4 }
  0xaf   : > { %v1283_v29 = vsel %vm1279_vm13, %v1281_v63, %v1277_v8  ;;  %v1288_v42 = vsel %vm1284_vm14, %v1287_v44, %v1282_v39  ;;  %vm1296_vm2 = vcmp.eq.s32.totalorder %v1256_v2, 5  ;;  %vm1297_vm3 = vcmp.eq.s32.totalorder %v1265_v53, 5 }
  0xb0   : > { %v990_v11 = vmul.f32 0.35355338, %v1762_v38  ;;  %v1289_v32 = vsel %vm1285_vm15, %v1287_v44, %v1283_v29  ;;  %v1294_v15 = vsel %vm1290_vm0, %v1293_v57, %v1288_v42  ;;  %vm1302_vm4 = vcmp.eq.s32.totalorder %v1256_v2, 6 }
  0xb1   : > { %v991_v9 = vmul.f32 0.35355338, %v1764_v51  ;;  %v1295_v1 = vsel %vm1291_vm1, %v1293_v57, %v1289_v32  ;;  %v1300_v34 = vsel %vm1296_vm2, %v1299_v30, %v1294_v15  ;;  %vm1303_vm5 = vcmp.eq.s32.totalorder %v1265_v53, 6 }
  0xb2   : > { %v992_v50 = vmul.f32 %v2480_v40, %v990_v11  ;;  %v1301_v35 = vsel %vm1297_vm3, %v1299_v30, %v1295_v1  ;;  %v1306_v27 = vsel %vm1302_vm4, %v1305_v59, %v1300_v34  ;;  %vm1308_vm6 = vcmp.eq.s32.totalorder %v1256_v2, 7 }
  0xb3   : > { %v993_v24 = vmul.f32 %v2482_v19, %v991_v9  ;;  %v1307_v49 = vsel %vm1303_vm5, %v1305_v59, %v1301_v35  ;;  %vm1309_vm7 = vcmp.eq.s32.totalorder %v1265_v53, 7  ;;  %v1312_v46 = vsel %vm1308_vm6, %v1311_v18, %v1306_v27 }
  0xb4   : > { %v994_v45 = vmul.f32 %v992_v50, %v2435_v5  ;;  %v998_v12 = vadd.f32 %v992_v50, %v787_v23  ;;  %v1313_v55 = vsel %vm1309_vm7, %v1311_v18, %v1307_v49  ;;  %v2681_v5 = vlaneseq }
  0xb5   : > { %v995_v56 = vmul.f32 %v993_v24, %v2441_v7  ;;  %v999_v13 = vadd.f32 %v993_v24, %v788_v48  ;;  %v1316_v40 = vcombine.low %v1312_v46, %v1313_v55  ;;  %v1133_v2 = vstv %s2571_s11 }
  0xb6   : > { %v996_v14 = vadd.f32 %v994_v45, %v789_v3  ;;  %v1020_v58 = vadd.f32 1e-06, %v998_v12  ;;  %vm2553_vm8 = vcmp.lt.s32.totalorder %v2681_v5, 256  ;;  %v1159_v8 = vstv %s2579_s14 }
  0xb7   : > { %v997_v52 = vadd.f32 %v995_v56, %v790_v54  ;;  %v1021_v19 = vadd.f32 1e-06, %v999_v13  ;;  %v1323_v26 = vrot.slane %v1316_v40, %v2052_v6  ;;  %v1120_v54 = vstv %s1119_s21 }
  0xb8   : > { %1765 = vrcp.f32 %v1020_v58  ;;  %v1172_v39 = vstv %s2583_s16  ;;  %v1185_v42 = vstv %s2587_s17  ;;  %v1198_v51 = vstv %s2591_s27 }
  0xb9   : > { %1767 = vrcp.f32 %v1021_v19  ;;  %v1330_v7 = vrot.slane %v1323_v26, %v2052_v6 }
  0xbb   : > { %1332 = vst.msk [vmem:[%s490_s13] sm:$0x3] %vm2553_vm8, %v1330_v7  ;;  %s2575_s13 = sld [smem:[#allocation2 + %s1144_s25]]  ;;  %s463_s25 = scalar_lea.vmem %s2660_s5, %s1683_s15 }
  0xbc   : > { %s472_s15 = scalar_lea.vmem %s2661_s6, %s2544_s20 }
  0xc1   : > { %v1146_v53 = vstv %s2575_s13 }
  0xc2   : > { %v1766_v0 = vpop.eup %1765 }
  0xc3   : > { %v1768_v43 = vpop.eup %1767  ;;  %v1023_v31 = vmul.f32 %v1766_v0, %v996_v14 }
  0xc4   : > { %v1025_v22 = vmul.f32 %v1768_v43, %v997_v52 }
  0xc5   : > { %v1028_v37 = vadd.f32 %v1027_v36, %v1023_v31 }
  0xc6   : > { %v1029_v28 = vadd.f32 %v1027_v36, %v1025_v22 }
  0xc7   : > { %1030 = vst [vmem:[%s453_s18] sm:$0xff] %v1028_v37  ;;  %v1032_v47 = vrot.slane %v1028_v37, 4 }
  0xc8   : > { %1031 = vst [vmem:[%s453_s18 + $0x8] sm:$0xff] %v1029_v28  ;;  %v1038_v41 = vrot.slane %v1029_v28, 4 }
  0xc9   : > { %v1033_v17 = vmax.f32 %v1028_v37, %v1032_v47 }
  0xca   : > { %v1039_v21 = vmax.f32 %v1029_v28, %v1038_v41 }
  0xcb   : > { %v1034_v62 = vrot.slane %v1033_v17, 2 }
  0xcc   : > { %v1040_v10 = vrot.slane %v1039_v21, 2 }
  0xcd   : > { %v1035_v63 = vmax.f32 %v1033_v17, %v1034_v62 }
  0xce   : > { %v1041_v44 = vmax.f32 %v1039_v21, %v1040_v10 }
  0xcf   : > { %v1036_v23 = vrot.slane %v1035_v63, 1 }
  0xd0   : > { %v1042_v48 = vrot.slane %v1041_v44, 1 }
  0xd1   : > { %v1037_v33 = vmax.f32 %v1035_v63, %v1036_v23 }
  0xd2   : > { %v1043_v57 = vmax.f32 %v1041_v44, %v1042_v48 }
  0xd3   : > { %v1044_v30 = vsub.f32 %v1028_v37, %v1037_v33 }
  0xd4   : > { %v1045_v59 = vsub.f32 %v1029_v28, %v1043_v57 }
  0xd5   : > { %v1046_v18 = vmul.f32 1.442695, %v1044_v30 }
  0xd6   : > { %v1048_v16 = vmul.f32 1.442695, %v1045_v59 }
  0xd7   : > { %1769 = vpow2.f32 %v1046_v18 }
  0xd8   : > { %1771 = vpow2.f32 %v1048_v16 }
  0xe1   : > { %v2593_v3 = vpop.eup %1769 }
  0xe2   : > { %v2597_v60 = vpop.eup %1771  ;;  %v1050_v25 = vrot.slane %v2593_v3, 4  ;;  %v2602_v20 = vmul.f32 %v2593_v3, %v2593_v3 }
  0xe3   : > { %v1056_v38 = vrot.slane %v2597_v60, 4  ;;  %v1094_v29 = vmul.f32 %v2597_v60, %v2597_v60 }
  0xe4   : > { %v1051_v11 = vadd.f32 %v2593_v3, %v1050_v25  ;;  %v1095_v32 = vrot.slane %v2602_v20, 4  ;;  %v1114_v15 = vmul.f32 %v1113_v61, %v2602_v20  ;;  %v1121_v9 = vmul.f32 %v1120_v54, %v2602_v20 }
  0xe5   : > { %v1057_v1 = vadd.f32 %v2597_v60, %v1056_v38  ;;  %v1101_v34 = vrot.slane %v1094_v29, 4  ;;  %v1115_v50 = vmul.f32 %v1113_v61, %v1094_v29  ;;  %v1122_v35 = vmul.f32 %v1120_v54, %v1094_v29 }
  0xe6   : > { %v1052_v27 = vrot.slane %v1051_v11, 2  ;;  %v1096_v24 = vadd.f32 %v1095_v32, %v2602_v20  ;;  %v1125_v49 = vrot.slane %v1121_v9, 1  ;;  %v1134_v46 = vmul.f32 %v1133_v2, %v2602_v20 }
  0xe7   : > { %v1058_v45 = vrot.slane %v1057_v1, 2  ;;  %v1102_v12 = vadd.f32 %v1101_v34, %v1094_v29  ;;  %v1126_v55 = vrot.slane %v1122_v35, 1  ;;  %v1135_v56 = vmul.f32 %v1133_v2, %v1094_v29 }
  0xe8   : > { %v1053_v13 = vadd.f32 %v1052_v27, %v1051_v11  ;;  %v1097_v40 = vrot.slane %v1096_v24, 2  ;;  %v1129_v14 = vadd.f32 %v1125_v49, %v1114_v15  ;;  %v1138_v58 = vrot.slane %v1134_v46, 2 }
  0xe9   : > { %v1059_v52 = vadd.f32 %v1058_v45, %v1057_v1  ;;  %v1103_v19 = vrot.slane %v1102_v12, 2  ;;  %v1130_v26 = vadd.f32 %v1126_v55, %v1115_v50  ;;  %v1139_v5 = vrot.slane %v1135_v56, 2 }
  0xea   : > { %v1054_v7 = vrot.slane %v1053_v13, 1  ;;  %v1098_v0 = vadd.f32 %v1097_v40, %v1096_v24  ;;  %v1142_v36 = vadd.f32 %v1138_v58, %v1129_v14  ;;  %v1147_v43 = vmul.f32 %v1146_v53, %v2602_v20 }
  0xeb   : > { %v1060_v31 = vrot.slane %v1059_v52, 1  ;;  %v1104_v22 = vadd.f32 %v1103_v19, %v1102_v12  ;;  %v1143_v37 = vadd.f32 %v1139_v5, %v1130_v26  ;;  %v1148_v28 = vmul.f32 %v1146_v53, %v1094_v29 }
  0xec   : > { %v1055_v47 = vadd.f32 %v1054_v7, %v1053_v13  ;;  %v1099_v41 = vrot.slane %v1098_v0, 1  ;;  %v1151_v17 = vrot.slane %v1147_v43, 3  ;;  %v1160_v21 = vmul.f32 %v1159_v8, %v2602_v20 }
  0xed   : > { %v1061_v62 = vadd.f32 %v1060_v31, %v1059_v52  ;;  %v1105_v10 = vrot.slane %v1104_v22, 1  ;;  %v1152_v63 = vrot.slane %v1148_v28, 3  ;;  %v1161_v44 = vmul.f32 %v1159_v8, %v1094_v29 }
  0xee   : > { %1773 = vrcp.f32 %v1055_v47  ;;  %v1100_v23 = vadd.f32 %v1099_v41, %v1098_v0  ;;  %v1155_v48 = vadd.f32 %v1151_v17, %v1142_v36  ;;  %v1164_v33 = vrot.slane %v1160_v21, 4 }
  0xef   : > { %1775 = vrcp.f32 %v1061_v62  ;;  %v1106_v57 = vadd.f32 %v1105_v10, %v1104_v22  ;;  %v1156_v30 = vadd.f32 %v1152_v63, %v1143_v37  ;;  %v1165_v59 = vrot.slane %v1161_v44, 4 }
  0xf0   : > { %1777 = vrcp.f32 %v1100_v23  ;;  %v1168_v18 = vadd.f32 %v1164_v33, %v1155_v48  ;;  %v1173_v16 = vmul.f32 %v1172_v39, %v2602_v20  ;;  %v1174_v61 = vmul.f32 %v1172_v39, %v1094_v29 }
  0xf1   : > { %1779 = vrcp.f32 %v1106_v57  ;;  %v1169_v54 = vadd.f32 %v1165_v59, %v1156_v30  ;;  %v1186_v2 = vmul.f32 %v1185_v42, %v2602_v20  ;;  %v1187_v53 = vmul.f32 %v1185_v42, %v1094_v29 }
  0xf2   : > { %v1177_v25 = vrot.slane %v1173_v16, 5  ;;  %v1178_v8 = vrot.slane %v1174_v61, 5  ;;  %v1199_v38 = vmul.f32 %v1198_v51, %v2602_v20  ;;  %v1200_v11 = vmul.f32 %v1198_v51, %v1094_v29 }
  0xf3   : > { %v1190_v32 = vrot.slane %v1186_v2, 6  ;;  %v1191_v15 = vrot.slane %v1187_v53, 6 }
  0xf4   : > { %v1181_v9 = vadd.f32 %v1177_v25, %v1168_v18  ;;  %v1182_v1 = vadd.f32 %v1178_v8, %v1169_v54  ;;  %v1203_v34 = vrot.slane %v1199_v38, 7  ;;  %v1204_v50 = vrot.slane %v1200_v11, 7 }
  0xf6   : > { %v1194_v35 = vadd.f32 %v1190_v32, %v1181_v9  ;;  %v1195_v27 = vadd.f32 %v1191_v15, %v1182_v1 }
  0xf8   : > { %v1774_v39 = vpop.eup %1773  ;;  %v1207_v42 = vadd.f32 %v1203_v34, %v1194_v35  ;;  %v1208_v24 = vadd.f32 %v1204_v50, %v1195_v27 }
  0xf9   : > { %v1776_v49 = vpop.eup %1775  ;;  %v1066_v20 = vmul.f32 %v1774_v39, %v2593_v3 }
  0xfa   : > { %v1778_v29 = vpop.eup %1777  ;;  %v1067_v51 = vmul.f32 %v1776_v49, %v2597_v60  ;;  %v1072_v46 = vcombine.low %v1774_v39, %v1776_v49 }
  0xfb   : > { %v1780_v45 = vpop.eup %1779  ;;  %1068 = vst [vmem:[%s463_s25] sm:$0xff] %v1066_v20  ;;  %v1209_v12 = vmul.f32 %v1778_v29, %v1207_v42 }
  0xfc   : > { %1069 = vst [vmem:[%s463_s25 + $0x8] sm:$0xff] %v1067_v51  ;;  %v1079_v55 = vrot.slane %v1072_v46, %v2052_v6  ;;  %v1210_v56 = vmul.f32 %v1780_v45, %v1208_v24 }
  0xfe   : > { %v1086_v13 = vrot.slane %v1079_v55, %v2052_v6  ;;  %v1213_v40 = vcombine.low %v1209_v12, %v1210_v56 }
 0x100   : > { %1092 = vst.msk [vmem:[%s481_s30] sm:$0x3] %vm2553_vm8, %v1086_v13  ;;  %v1220_v3 = vrot.slane %v1213_v40, %v2052_v6 }
 0x102   : > { %v1227_v60 = vrot.slane %v1220_v3, %v2052_v6 }
 0x104   : > { %1229 = vst.msk [vmem:[%s472_s15] sm:$0x3] %vm2553_vm8, %v1227_v60 }
 0x105 PF: > { %s21_s29 = sadd.s32 1, %s1921_s29   ;;  %s2684_s27 = smov %s1917_s28 }
 0x106   : > { %p18_p4 = scmp.ge.s32.totalorder %s21_s29, 4   ;;  %s2685_s28 = smov %s2687_s9 }
 0x108   :  { %20 = sbr.rel (!%p18_p4) target bundleno = 3 (0x3), region = 136 }
 0x10f   :  { %1457 = vsyncpa [#allocation3], 1 }
 0x110   :  { %1459 = vsyncpa [#allocation3 + $0x1], 1 }
 0x111   :  { %1460 = vsyncpa [#allocation5], 1 }

// kernel: squeeze.47
= control target key start
LH: loop header
LB: loop body
LE: loop exit
PB: predicated region body
PF: predicated region fallthrough
CT: control target
= control target key end

     0   :  { %s149_s0 = inlined_call_operand.vmem [shape: f32[2,256], index: 0, kind: input, shape index: {}]   ;;  %s150_s1 = inlined_call_operand.hbm [shape: f32[2,16,16], index: 1, kind: output, shape index: {}]  }
   0x1   :  { %v71_v0 = vld [vmem:[%s149_s0 + $0x2] sm:$0x3]  ;;  %v9_v1 = vld [vmem:[%s149_s0] sm:$0x3] }
   0x2   :  { %8 = vst [vmem:[#allocation2 + $0x8] sm:$0x3] %v71_v0  ;;  %10 = vst [vmem:[#allocation2] sm:$0x3] %v9_v1 }
   0x3   :  { %2 = vsyncpa [#allocation1], 0  ;;  %vm12_vm0 = vcmask 130048   ;;  %s104_s0 = smov 112   ;;  %s105_s10 = smov 80  }
   0x4   :  { %s106_s11 = smov 96   ;;  %s107_s12 = smov 64  }
   0x5   :  { %s108_s13 = smov 48   ;;  %s109_s14 = smov 32  }
   0x6   :  { %s110_s15 = smov 16   ;;  %s111_s16 = smov [#allocation0]  }
   0x7   :  { %s65_s17 = sshll.u32 %s111_s16, 4  ;;  %s66_s17 = int_to_ptr.vmem [resolvable:$true] %s65_s17 }
   0x8   :  { %s80_s18 = scalar_lea.vmem %s66_s17, 512  ;;  %p85_p1 = scmp.lt.s32.totalorder %s66_s17, %s66_s17 }
   0x9   :  { %v19_v2 = vld.sshfl [vmem:[#allocation2] sm:$0xff pattern:$0x99999180]   ;;  %p81_p0 = scmp.ne.s32.totalorder %s66_s17, %s80_s18  ;;  %p86_p2 = scmp.lt.s32.totalorder %s80_s18, %s80_s18 }
   0xa   :  { %v11_v3 = vld [vmem:[#allocation2] sm:$0x3]   ;;  %20 = vrot.lane.b32.xlu0 %v19_v2, %s104_s0  ;;  %32 = vrot.lane.b32.xlu1 %v19_v2, %s105_s10  ;;  %v15_v4 = vld [vmem:[#allocation2 + $0x8] sm:$0x3]  }
   0xb   :  { %13 = vst.msk [vmem:[#allocation0] ss:$16 sm:$0x3] %vm12_vm0, %v11_v3   ;;  %18 = vst.msk [vmem:[#allocation0 + $0x8] ss:$16 sm:$0x3] %vm12_vm0, %v15_v4   ;;  %p87_p3 = por %p86_p2, %p85_p1 }
   0xd   :  { %p88_p4 = pnand %p87_p3, %p81_p0 }
   0xe   :  { %26 = vrot.lane.b32.xlu0 %v19_v2, %s106_s11  ;;  %38 = vrot.lane.b32.xlu1 %v19_v2, %s107_s12 }
  0x12   :  { %44 = vrot.lane.b32.xlu0 %v19_v2, %s108_s13  ;;  %50 = vrot.lane.b32.xlu1 %v19_v2, %s109_s14 }
  0x16   :  { %56 = vrot.lane.b32.xlu0 %v19_v2, %s110_s15 }
  0x7c   :  { %v21_v5 = vpop.permute.xlu0 %20   ;;  %v33_v6 = vpop.permute.xlu1 %32  }
  0x7d   :  { %24 = vst.msk [vmem:[#allocation0 + $0x1] ss:$8 sm:$0xf] %vm12_vm0, %v21_v5   ;;  %36 = vst.msk [vmem:[#allocation0 + $0x3] ss:$8 sm:$0xf] %vm12_vm0, %v33_v6  }
  0x80   :  { %v27_v7 = vpop.permute.xlu0 %26   ;;  %v39_v8 = vpop.permute.xlu1 %38  }
  0x81   :  { %30 = vst.msk [vmem:[#allocation0 + $0x2] ss:$8 sm:$0xf] %vm12_vm0, %v27_v7   ;;  %42 = vst.msk [vmem:[#allocation0 + $0x4] ss:$8 sm:$0xf] %vm12_vm0, %v39_v8  }
  0x84   :  { %v45_v9 = vpop.permute.xlu0 %44   ;;  %v51_v10 = vpop.permute.xlu1 %50  }
  0x85   :  { %48 = vst.msk [vmem:[#allocation0 + $0x5] ss:$8 sm:$0xf] %vm12_vm0, %v45_v9   ;;  %54 = vst.msk [vmem:[#allocation0 + $0x6] ss:$8 sm:$0xf] %vm12_vm0, %v51_v10  }
  0x88   :  { %v57_v11 = vpop.permute.xlu0 %56  }
  0x89   :  { %60 = vst.msk [vmem:[#allocation0 + $0x7] ss:$8 sm:$0xf] %vm12_vm0, %v57_v11  }
  0x8a   :  { %91 = shalt.err (!%p88_p4)
}
  0x8b   :  { %s92_s21 = scalar_lea.hbm %s150_s1, 512 }
  0x8c   :  { %p93_p5 = scmp.ne.s32.totalorder %s150_s1, %s92_s21  ;;  %p96_p6 = scmp.lt.u32.totalorder %s92_s21, %s150_s1 }
  0x8e   :  { %p98_p7 = pnand %p96_p6, %p93_p5 }
  0x90   :  { %101 = shalt.err (!%p98_p7)
}
  0x91   :  { %68 = dma.vmem_to_hbm [thread:$0]  %s66_s17, 512, %s150_s1, [#allocation1]  }
  0x92   :  { %102 = dma.done.wait [#allocation1], 512  }
  0x93   :  { %103 = vsyncadd [#allocation1], 4294966784 }
  0x94   :  { %70 = vsyncpa [#allocation1], 1 }

</bundles_post_ra>
